<compile_context>
chip_gen: v7x
topology: tpu7x:2x2x1
jax: 0.10.0
libtpu: 0.0.40
codegen_flags: <defaults>
</compile_context>

<pallas_src>
import functools
import math

import jax
import jax.numpy as jnp
from jax.experimental import pallas as pl
from jax.experimental.pallas import tpu as pltpu


# ---------------------------------------------------------------------------
# Model hyper-parameters (small, consistent with the module's semantics)
# ---------------------------------------------------------------------------
B = 2
C = 3
IMG = 32                        # image_size
PAD = 4                         # pad_size (border width of the reprogramming program)
PATCH = 8
GH = GW = IMG // PATCH          # 4 x 4 patch grid
N_TOK = GH * GW                 # 16 image tokens
PDIM = PATCH * PATCH * C        # 192
D_ENC = 64                      # encoder width
E = 32                          # SAM prompt/decoder embed dim
FH = FW = GH                    # feature-map spatial size (4 x 4)
HW = FH * FW                    # 16
N_MASK_TOK = 4                  # SAM mask tokens
NT = 1 + N_MASK_TOK + 2         # 7 decoder tokens (iou + 4 mask + 2 box corners)
NT_PAD = 8                      # pad with 1 inert query so reshapes are (8,·)-tile aligned
E_UP = 8                        # "upscaled" per-pixel feature dim


# ---------------------------------------------------------------------------
# The single fused Pallas kernel
# ---------------------------------------------------------------------------
def _repsam_kernel(
    xp_ref, progp_ref, posb_ref,
    w_patch_ref,
    ln1_g_ref, ln1_b_ref, w_qkv_ref, b_qkv_ref, w_ao_ref, b_ao_ref,
    ln2_g_ref, ln2_b_ref, w_mlp1_ref, b_mlp1_ref, w_mlp2_ref, b_mlp2_ref,
    w_neck_ref, b_neck_ref,
    no_mask_ref, image_pe_ref, tokens_ref,
    dwq_ref, dbq_ref, dwk_ref, dbk_ref, dwv_ref, dbv_ref, dwo_ref, dbo_ref,
    w_hyp1_ref, b_hyp1_ref, w_hyp2_ref, b_hyp2_ref, w_up_ref, b_up_ref,
    mask_ref,
):
    f32 = jnp.float32
    bf16 = jnp.bfloat16

    def mm(a, w_ref, b_ref):
        # bf16 MXU operands, f32 accumulation, f32 bias add.
        return jnp.dot(a.astype(bf16), w_ref[...],
                       preferred_element_type=f32) + b_ref[...]

    def layernorm(x, g_ref, b_ref, eps=1e-5):
        # f32 VPU/EUP math.
        mu = jnp.mean(x, axis=-1, keepdims=True)
        var = jnp.mean((x - mu) ** 2, axis=-1, keepdims=True)
        return (x - mu) * jax.lax.rsqrt(var + eps) * g_ref[...] + b_ref[...]

    def attend(q, k, v, scale):
        # q: [B,Tq,D], k/v: [B,Tk,D]; scale folded into q, softmax math in f32,
        # MXU operands bf16, EUP approx reciprocal for the denominator.
        s = jnp.einsum('bqd,bkd->bqk', (q * scale).astype(bf16), k.astype(bf16),
                       preferred_element_type=f32)
        s = s - jnp.max(s, axis=-1, keepdims=True)
        p = jnp.exp(s)
        p = p * pl.reciprocal(jnp.sum(p, axis=-1, keepdims=True), approx=True)
        return jnp.einsum('bqk,bkd->bqd', p.astype(bf16), v.astype(bf16),
                          preferred_element_type=f32)

    # ---- 1. reprogrammer ("pad" method): learned border program, pre-patchified
    prompted = xp_ref[...] + progp_ref[...]                        # [B*T, PDIM] f32

    # ---- 2. image encoder: patch embed (+pos) + 1 transformer block + neck
    # TODO(synk): real SAM ViT-H image encoder (many blocks, windowed attention)
    # is reduced here to a single global-attention transformer block.
    tok = jnp.dot(prompted.astype(bf16), w_patch_ref[...],
                  preferred_element_type=f32) + posb_ref[...]      # [B*T, D_ENC]

    h = layernorm(tok, ln1_g_ref, ln1_b_ref)
    qkv = mm(h, w_qkv_ref, b_qkv_ref).reshape(B, N_TOK, 3 * D_ENC)  # fused QKV
    q = qkv[:, :, 0:D_ENC]
    k = qkv[:, :, D_ENC:2 * D_ENC]
    v = qkv[:, :, 2 * D_ENC:3 * D_ENC]
    attn = attend(q, k, v, 1.0 / math.sqrt(D_ENC))                 # [B, T, D_ENC]
    tok = tok + mm(attn.reshape(B * N_TOK, D_ENC), w_ao_ref, b_ao_ref)

    h = layernorm(tok, ln2_g_ref, ln2_b_ref)
    m1 = jax.nn.gelu(mm(h, w_mlp1_ref, b_mlp1_ref), approximate=True)   # f32 GELU
    tok = tok + mm(m1, w_mlp2_ref, b_mlp2_ref)

    feat = mm(tok, w_neck_ref, b_neck_ref)                         # [B*HW, E]

    # ---- 3/4. prompt-conditioned mask decoder
    # TODO(synk): SAM's two-way transformer (2 layers) and 4x transposed-conv
    # upscaling are reduced to one token->image cross-attention + per-pixel linear.
    src = feat + no_mask_ref[...]                                  # dense no-mask embed
    src_pe = src + image_pe_ref[...]                               # + dense positional enc

    # q comes from tokens, k from src+pe, v from src (different LHS tensors, so a
    # single fused qkv matmul would change semantics here - kept separate).
    tokens = tokens_ref[...]                                       # [B*NT_PAD, E]
    qd = mm(tokens, dwq_ref, dbq_ref).reshape(B, NT_PAD, E)
    kd = mm(src_pe, dwk_ref, dbk_ref).reshape(B, HW, E)
    vd = mm(src, dwv_ref, dbv_ref).reshape(B, HW, E)
    cross = attend(qd, kd, vd, 1.0 / math.sqrt(E))                 # [B, NT_PAD, E]
    tokens = tokens + mm(cross.reshape(B * NT_PAD, E), dwo_ref, dbo_ref)

    # multimask_output=False -> single mask from mask token index 0 (token slot 1)
    mask_tok = tokens.reshape(B, NT_PAD, E)[:, 1, :]               # [B, E]
    hyp = jnp.maximum(mm(mask_tok, w_hyp1_ref, b_hyp1_ref), 0.0)
    hyp = mm(hyp, w_hyp2_ref, b_hyp2_ref)                          # [B, E_UP]

    ups = mm(src, w_up_ref, b_up_ref).reshape(B, HW, E_UP)         # [B, HW, E_UP]
    # masks[b, 0, p] = <hyp[b], ups[b, p]>  (MXU dot, flash-score einsum pattern)
    mask_ref[...] = jnp.einsum('bqd,bkd->bqk', hyp.reshape(B, 1, E_UP), ups,
                               preferred_element_type=f32)         # [B, 1, HW]


# ---------------------------------------------------------------------------
# Host-side helpers (layout plumbing + param-only precompute; no image-sized math)
# ---------------------------------------------------------------------------
def _patchify(img):
    """[N, C, IMG, IMG] NCHW -> [N * N_TOK, PDIM] lane-dense token-major slab."""
    n = img.shape[0]
    p = img.reshape(n, C, GH, PATCH, GW, PATCH)
    p = p.transpose(0, 2, 4, 3, 5, 1)              # [n, GH, GW, PATCH, PATCH, C]
    return p.reshape(n * N_TOK, PDIM)


def _fourier_pe(coords01, gauss):
    """coords01: [..., 2] in [0,1]; gauss: [2, E//2] -> [..., E]."""
    c = 2.0 * coords01 - 1.0
    proj = 2.0 * jnp.pi * (c @ gauss)
    return jnp.concatenate([jnp.sin(proj), jnp.cos(proj)], axis=-1)


def make_params(key):
    ks = jax.random.split(key, 24)
    s = 0.02
    p = {}
    p['program'] = 0.1 * jax.random.normal(ks[0], (1, C, IMG, IMG), jnp.float32)
    p['w_patch'] = s * jax.random.normal(ks[1], (PDIM, D_ENC), jnp.float32)
    p['b_patch'] = jnp.zeros((D_ENC,), jnp.float32)
    p['pos_embed'] = s * jax.random.normal(ks[2], (N_TOK, D_ENC), jnp.float32)
    p['ln1_g'] = jnp.ones((D_ENC,), jnp.float32)
    p['ln1_b'] = jnp.zeros((D_ENC,), jnp.float32)
    p['ln2_g'] = jnp.ones((D_ENC,), jnp.float32)
    p['ln2_b'] = jnp.zeros((D_ENC,), jnp.float32)
    for i, name in enumerate(['wq', 'wk', 'wv', 'wo']):
        p[name] = s * jax.random.normal(ks[3 + i], (D_ENC, D_ENC), jnp.float32)
        p['b' + name[1]] = jnp.zeros((D_ENC,), jnp.float32)
    p['w_mlp1'] = s * jax.random.normal(ks[7], (D_ENC, 2 * D_ENC), jnp.float32)
    p['b_mlp1'] = jnp.zeros((2 * D_ENC,), jnp.float32)
    p['w_mlp2'] = s * jax.random.normal(ks[8], (2 * D_ENC, D_ENC), jnp.float32)
    p['b_mlp2'] = jnp.zeros((D_ENC,), jnp.float32)
    p['w_neck'] = s * jax.random.normal(ks[9], (D_ENC, E), jnp.float32)
    p['b_neck'] = jnp.zeros((E,), jnp.float32)
    # prompt encoder
    p['pe_gauss'] = jax.random.normal(ks[10], (2, E // 2), jnp.float32)
    p['corner_embed'] = s * jax.random.normal(ks[11], (2, E), jnp.float32)
    p['no_mask_embed'] = s * jax.random.normal(ks[12], (E,), jnp.float32)
    # mask decoder
    p['output_tokens'] = s * jax.random.normal(
        ks[13], (1 + N_MASK_TOK, E), jnp.float32)    # iou token + 4 mask tokens
    for i, name in enumerate(['dwq', 'dwk', 'dwv', 'dwo']):
        p[name] = s * jax.random.normal(ks[14 + i], (E, E), jnp.float32)
        p['db' + name[2]] = jnp.zeros((E,), jnp.float32)
    p['w_hyp1'] = s * jax.random.normal(ks[18], (E, E), jnp.float32)
    p['b_hyp1'] = jnp.zeros((E,), jnp.float32)
    p['w_hyp2'] = s * jax.random.normal(ks[19], (E, E_UP), jnp.float32)
    p['b_hyp2'] = jnp.zeros((E_UP,), jnp.float32)
    p['w_up'] = s * jax.random.normal(ks[20], (E, E_UP), jnp.float32)
    p['b_up'] = jnp.zeros((E_UP,), jnp.float32)
    return p


def precompute(params):
    """One-time, param-only preprocessing into the layout the fused kernel eats:
    bf16 MXU weights, (1, N) f32 biases, fused QKV, pre-patchified program,
    precomputed dense positional encoding."""
    f32, bf16 = jnp.float32, jnp.bfloat16

    def row(b):
        return b.reshape(1, -1).astype(f32)

    prep = {}
    # reprogrammer: program * border_mask, patchified & tiled over batch (24 KiB).
    border = jnp.ones((IMG, IMG), f32).at[PAD:IMG - PAD, PAD:IMG - PAD].set(0.0)
    progp = _patchify(params['program'] * border[None, None])       # [N_TOK, PDIM]
    prep['progp'] = jnp.tile(progp, (B, 1))                         # [B*N_TOK, PDIM]

    # patch-embed bias + positional embedding folded into one per-row add term.
    prep['posb'] = jnp.tile(params['pos_embed'] + params['b_patch'][None], (B, 1))
    prep['w_patch'] = params['w_patch'].astype(bf16)

    prep['ln1_g'] = row(params['ln1_g']); prep['ln1_b'] = row(params['ln1_b'])
    prep['ln2_g'] = row(params['ln2_g']); prep['ln2_b'] = row(params['ln2_b'])

    # fused encoder QKV (same LHS for q/k/v).
    prep['w_qkv'] = jnp.concatenate(
        [params['wq'], params['wk'], params['wv']], axis=1).astype(bf16)
    prep['b_qkv'] = jnp.concatenate(
        [params['bq'], params['bk'], params['bv']], axis=0).reshape(1, 3 * D_ENC)
    prep['w_ao'] = params['wo'].astype(bf16); prep['b_ao'] = row(params['bo'])

    prep['w_mlp1'] = params['w_mlp1'].astype(bf16); prep['b_mlp1'] = row(params['b_mlp1'])
    prep['w_mlp2'] = params['w_mlp2'].astype(bf16); prep['b_mlp2'] = row(params['b_mlp2'])
    prep['w_neck'] = params['w_neck'].astype(bf16); prep['b_neck'] = row(params['b_neck'])

    prep['no_mask'] = row(params['no_mask_embed'])

    # dense positional encoding of the feature grid: constant per model -> precompute.
    ys = (jnp.arange(FH, dtype=f32) + 0.5) / FH
    xs = (jnp.arange(FW, dtype=f32) + 0.5) / FW
    gy, gx = jnp.meshgrid(ys, xs, indexing='ij')
    grid = jnp.stack([gx, gy], axis=-1).reshape(HW, 2)
    image_pe = _fourier_pe(grid, params['pe_gauss'])                # [HW, E]
    prep['image_pe'] = jnp.tile(image_pe, (B, 1))                   # [B*HW, E]

    for name in ['dwq', 'dwk', 'dwv', 'dwo']:
        prep[name] = params[name].astype(bf16)
        prep['db' + name[2]] = row(params['db' + name[2]])
    prep['w_hyp1'] = params['w_hyp1'].astype(bf16); prep['b_hyp1'] = row(params['b_hyp1'])
    prep['w_hyp2'] = params['w_hyp2'].astype(bf16); prep['b_hyp2'] = row(params['b_hyp2'])
    prep['w_up'] = params['w_up'].astype(bf16); prep['b_up'] = row(params['b_up'])

    # runtime prompt-encoder params (f32, used host-side per call).
    prep['pe_gauss'] = params['pe_gauss']
    prep['corner_embed'] = params['corner_embed']
    prep['output_tokens'] = params['output_tokens']
    return prep


# ---------------------------------------------------------------------------
# RepSAM forward pass: one fused pallas_call
# ---------------------------------------------------------------------------
def repsam_forward(prep, x, bbox_tensor):
    f32 = jnp.float32

    # Layout plumbing only: present the kernel with a lane-dense token-major slab
    # instead of NCHW 32-wide rows.
    xp = _patchify(x.astype(f32))                                   # [B*N_TOK, PDIM]

    # Prompt encoder, sparse part: box corners -> Fourier PE + corner embedding.
    # A few dozen VPU flops; not worth a K=2 matmul or a kernel launch.
    corners = bbox_tensor.reshape(B, 2, 2) / float(IMG)
    sparse = _fourier_pe(corners, prep['pe_gauss']) + prep['corner_embed'][None]

    # Decoder tokens: [iou, 4 mask tokens, 2 box corners, 1 zero pad] -> NT_PAD = 8.
    # The pad token is an inert extra query (cross-attention rows are independent;
    # its output is never read), added only so in-kernel reshapes are tile-aligned.
    out_tok = jnp.broadcast_to(prep['output_tokens'][None], (B, 1 + N_MASK_TOK, E))
    pad_tok = jnp.zeros((B, NT_PAD - NT, E), f32)
    tokens = jnp.concatenate([out_tok, sparse, pad_tok], axis=1)
    tokens = tokens.reshape(B * NT_PAD, E)

    args = (
        xp, prep['progp'], prep['posb'],
        prep['w_patch'],
        prep['ln1_g'], prep['ln1_b'], prep['w_qkv'], prep['b_qkv'],
        prep['w_ao'], prep['b_ao'],
        prep['ln2_g'], prep['ln2_b'],
        prep['w_mlp1'], prep['b_mlp1'], prep['w_mlp2'], prep['b_mlp2'],
        prep['w_neck'], prep['b_neck'],
        prep['no_mask'], prep['image_pe'], tokens,
        prep['dwq'], prep['dbq'], prep['dwk'], prep['dbk'],
        prep['dwv'], prep['dbv'], prep['dwo'], prep['dbo'],
        prep['w_hyp1'], prep['b_hyp1'], prep['w_hyp2'], prep['b_hyp2'],
        prep['w_up'], prep['b_up'],
    )
    vmem = functools.partial(pl.BlockSpec, memory_space=pltpu.MemorySpace.VMEM)
    masks = pl.pallas_call(
        _repsam_kernel,
        out_shape=jax.ShapeDtypeStruct((B, 1, HW), jnp.float32),
        in_specs=[vmem() for _ in args],
        out_specs=vmem(),
    )(*args)

    # NCHW, single mask (multimask_output=False)
    return masks.reshape(B, 1, FH, FW)


# ---------------------------------------------------------------------------

if __name__ == "__main__":
    key = jax.random.PRNGKey(0)
    k_param, k_x = jax.random.split(key)
    params = make_params(k_param)
    prep = precompute(params)                                        # once, off the hot path

    x = jax.random.normal(k_x, (B, C, IMG, IMG), jnp.float32)        # NCHW image
    bbox_tensor = jnp.array([[4.0, 4.0, 28.0, 28.0],
                             [8.0, 6.0, 24.0, 26.0]], jnp.float32)   # [B, 4] xyxy

    fwd = jax.jit(repsam_forward)
    masks = jax.block_until_ready(fwd(prep, x, bbox_tensor))

    assert masks.shape == (B, 1, FH, FW)
    assert bool(jnp.all(jnp.isfinite(masks)))
    print("KERNEL_OK")
</pallas_src>

<mosaic_0001>
module attributes {stable_mosaic.version = 11 : i64} {
  func.func @_repsam_kernel(%arg0: memref<32x192xf32, #tpu.memory_space<vmem>>, %arg1: memref<32x192xf32, #tpu.memory_space<vmem>>, %arg2: memref<32x64xf32, #tpu.memory_space<vmem>>, %arg3: memref<192x64xbf16, #tpu.memory_space<vmem>>, %arg4: memref<1x64xf32, #tpu.memory_space<vmem>>, %arg5: memref<1x64xf32, #tpu.memory_space<vmem>>, %arg6: memref<64x192xbf16, #tpu.memory_space<vmem>>, %arg7: memref<1x192xf32, #tpu.memory_space<vmem>>, %arg8: memref<64x64xbf16, #tpu.memory_space<vmem>>, %arg9: memref<1x64xf32, #tpu.memory_space<vmem>>, %arg10: memref<1x64xf32, #tpu.memory_space<vmem>>, %arg11: memref<1x64xf32, #tpu.memory_space<vmem>>, %arg12: memref<64x128xbf16, #tpu.memory_space<vmem>>, %arg13: memref<1x128xf32, #tpu.memory_space<vmem>>, %arg14: memref<128x64xbf16, #tpu.memory_space<vmem>>, %arg15: memref<1x64xf32, #tpu.memory_space<vmem>>, %arg16: memref<64x32xbf16, #tpu.memory_space<vmem>>, %arg17: memref<1x32xf32, #tpu.memory_space<vmem>>, %arg18: memref<1x32xf32, #tpu.memory_space<vmem>>, %arg19: memref<32x32xf32, #tpu.memory_space<vmem>>, %arg20: memref<16x32xf32, #tpu.memory_space<vmem>>, %arg21: memref<32x32xbf16, #tpu.memory_space<vmem>>, %arg22: memref<1x32xf32, #tpu.memory_space<vmem>>, %arg23: memref<32x32xbf16, #tpu.memory_space<vmem>>, %arg24: memref<1x32xf32, #tpu.memory_space<vmem>>, %arg25: memref<32x32xbf16, #tpu.memory_space<vmem>>, %arg26: memref<1x32xf32, #tpu.memory_space<vmem>>, %arg27: memref<32x32xbf16, #tpu.memory_space<vmem>>, %arg28: memref<1x32xf32, #tpu.memory_space<vmem>>, %arg29: memref<32x32xbf16, #tpu.memory_space<vmem>>, %arg30: memref<1x32xf32, #tpu.memory_space<vmem>>, %arg31: memref<32x8xbf16, #tpu.memory_space<vmem>>, %arg32: memref<1x8xf32, #tpu.memory_space<vmem>>, %arg33: memref<32x8xbf16, #tpu.memory_space<vmem>>, %arg34: memref<1x8xf32, #tpu.memory_space<vmem>>, %arg35: memref<2x1x16xf32, #tpu.memory_space<vmem>>) attributes {dimension_semantics = [], scalar_prefetch = 0 : i64, scratch_operands = 0 : i64, tpu.core_type = #tpu.core_type<tc>} {
    %c0 = arith.constant 0 : index
    %c0_0 = arith.constant 0 : index
    %0 = vector.load %arg0[%c0, %c0_0] : memref<32x192xf32, #tpu.memory_space<vmem>>, vector<32x192xf32>
    %c0_1 = arith.constant 0 : index
    %c0_2 = arith.constant 0 : index
    %1 = vector.load %arg1[%c0_1, %c0_2] : memref<32x192xf32, #tpu.memory_space<vmem>>, vector<32x192xf32>
    %2 = arith.addf %0, %1 : vector<32x192xf32>
    %3 = arith.truncf %2 : vector<32x192xf32> to vector<32x192xbf16>
    %c0_3 = arith.constant 0 : index
    %c0_4 = arith.constant 0 : index
    %4 = vector.load %arg3[%c0_3, %c0_4] : memref<192x64xbf16, #tpu.memory_space<vmem>>, vector<192x64xbf16>
    %cst = arith.constant dense<0.000000e+00> : vector<32x64xf32>
    %5 = tpu.matmul %3, %4, %cst {dimension_numbers = #tpu.dot_dimension_numbers<[1], [0], [0], [1], [0, 0, 1, 1], [], []>} : vector<32x192xbf16>, vector<192x64xbf16>, vector<32x64xf32> -> vector<32x64xf32>
    %c0_5 = arith.constant 0 : index
    %c0_6 = arith.constant 0 : index
    %6 = vector.load %arg2[%c0_5, %c0_6] : memref<32x64xf32, #tpu.memory_space<vmem>>, vector<32x64xf32>
    %7 = arith.addf %5, %6 : vector<32x64xf32>
    %cst_7 = arith.constant dense<0.000000e+00> : vector<32xf32>
    %8 = vector.multi_reduction <add>, %7, %cst_7 [1] : vector<32x64xf32> to vector<32xf32>
    %9 = vector.shape_cast %8 : vector<32xf32> to vector<32x1xf32>
    %cst_8 = arith.constant 6.400000e+01 : f32
    %10 = vector.broadcast %cst_8 : f32 to vector<32x1xf32>
    %11 = arith.divf %9, %10 : vector<32x1xf32>
    %12 = vector.broadcast %11 : vector<32x1xf32> to vector<32x64xf32>
    %13 = arith.subf %7, %12 : vector<32x64xf32>
    %14 = arith.mulf %13, %13 : vector<32x64xf32>
    %cst_9 = arith.constant dense<0.000000e+00> : vector<32xf32>
    %15 = vector.multi_reduction <add>, %14, %cst_9 [1] : vector<32x64xf32> to vector<32xf32>
    %16 = vector.shape_cast %15 : vector<32xf32> to vector<32x1xf32>
    %cst_10 = arith.constant 6.400000e+01 : f32
    %17 = vector.broadcast %cst_10 : f32 to vector<32x1xf32>
    %18 = arith.divf %16, %17 : vector<32x1xf32>
    %19 = vector.broadcast %11 : vector<32x1xf32> to vector<32x64xf32>
    %20 = arith.subf %7, %19 : vector<32x64xf32>
    %cst_11 = arith.constant 9.99999974E-6 : f32
    %21 = vector.broadcast %cst_11 : f32 to vector<32x1xf32>
    %22 = arith.addf %18, %21 : vector<32x1xf32>
    %23 = math.rsqrt %22 : vector<32x1xf32>
    %24 = vector.broadcast %23 : vector<32x1xf32> to vector<32x64xf32>
    %25 = arith.mulf %20, %24 : vector<32x64xf32>
    %c0_12 = arith.constant 0 : index
    %c0_13 = arith.constant 0 : index
    %26 = vector.load %arg4[%c0_12, %c0_13] : memref<1x64xf32, #tpu.memory_space<vmem>>, vector<1x64xf32>
    %27 = vector.broadcast %26 : vector<1x64xf32> to vector<32x64xf32>
    %28 = arith.mulf %25, %27 : vector<32x64xf32>
    %c0_14 = arith.constant 0 : index
    %c0_15 = arith.constant 0 : index
    %29 = vector.load %arg5[%c0_14, %c0_15] : memref<1x64xf32, #tpu.memory_space<vmem>>, vector<1x64xf32>
    %30 = vector.broadcast %29 : vector<1x64xf32> to vector<32x64xf32>
    %31 = arith.addf %28, %30 : vector<32x64xf32>
    %32 = arith.truncf %31 : vector<32x64xf32> to vector<32x64xbf16>
    %c0_16 = arith.constant 0 : index
    %c0_17 = arith.constant 0 : index
    %33 = vector.load %arg6[%c0_16, %c0_17] : memref<64x192xbf16, #tpu.memory_space<vmem>>, vector<64x192xbf16>
    %cst_18 = arith.constant dense<0.000000e+00> : vector<32x192xf32>
    %34 = tpu.matmul %32, %33, %cst_18 {dimension_numbers = #tpu.dot_dimension_numbers<[1], [0], [0], [1], [0, 0, 1, 1], [], []>} : vector<32x64xbf16>, vector<64x192xbf16>, vector<32x192xf32> -> vector<32x192xf32>
    %c0_19 = arith.constant 0 : index
    %c0_20 = arith.constant 0 : index
    %35 = vector.load %arg7[%c0_19, %c0_20] : memref<1x192xf32, #tpu.memory_space<vmem>>, vector<1x192xf32>
    %36 = vector.broadcast %35 : vector<1x192xf32> to vector<32x192xf32>
    %37 = arith.addf %34, %36 : vector<32x192xf32>
    %38 = vector.shape_cast %37 : vector<32x192xf32> to vector<2x16x192xf32>
    %39 = vector.extract_strided_slice %38 {offsets = [0, 0, 0], sizes = [2, 16, 64], strides = [1, 1, 1]} : vector<2x16x192xf32> to vector<2x16x64xf32>
    %40 = vector.extract_strided_slice %38 {offsets = [0, 0, 64], sizes = [2, 16, 64], strides = [1, 1, 1]} : vector<2x16x192xf32> to vector<2x16x64xf32>
    %41 = vector.extract_strided_slice %38 {offsets = [0, 0, 128], sizes = [2, 16, 64], strides = [1, 1, 1]} : vector<2x16x192xf32> to vector<2x16x64xf32>
    %cst_21 = arith.constant 1.250000e-01 : f32
    %42 = vector.broadcast %cst_21 : f32 to vector<2x16x64xf32>
    %43 = arith.mulf %39, %42 : vector<2x16x64xf32>
    %44 = arith.truncf %43 : vector<2x16x64xf32> to vector<2x16x64xbf16>
    %45 = arith.truncf %40 : vector<2x16x64xf32> to vector<2x16x64xbf16>
    "tpu.trace_start"() <{level = 10 : i32, message = "bqd,bkd->bqk"}> : () -> ()
    %cst_22 = arith.constant dense<0.000000e+00> : vector<2x16x16xf32>
    %46 = tpu.matmul %44, %45, %cst_22 {dimension_numbers = #tpu.dot_dimension_numbers<[2], [2], [1], [1], [0, 0, 0, 1, 1, 1], [0], [0]>} : vector<2x16x64xbf16>, vector<2x16x64xbf16>, vector<2x16x16xf32> -> vector<2x16x16xf32>
    "tpu.trace_stop"() : () -> ()
    %cst_23 = arith.constant dense<0xFF800000> : vector<2x16xf32>
    %47 = vector.multi_reduction <maximumf>, %46, %cst_23 [2] : vector<2x16x16xf32> to vector<2x16xf32>
    %48 = vector.shape_cast %47 : vector<2x16xf32> to vector<2x16x1xf32>
    %49 = vector.broadcast %48 : vector<2x16x1xf32> to vector<2x16x16xf32>
    %50 = arith.subf %46, %49 : vector<2x16x16xf32>
    %51 = math.exp %50 : vector<2x16x16xf32>
    %cst_24 = arith.constant dense<0.000000e+00> : vector<2x16xf32>
    %52 = vector.multi_reduction <add>, %51, %cst_24 [2] : vector<2x16x16xf32> to vector<2x16xf32>
    %53 = vector.shape_cast %52 : vector<2x16xf32> to vector<2x16x1xf32>
    %54 = tpu.reciprocal %53 {approx = true} : vector<2x16x1xf32> -> vector<2x16x1xf32>
    %55 = vector.broadcast %54 : vector<2x16x1xf32> to vector<2x16x16xf32>
    %56 = arith.mulf %51, %55 : vector<2x16x16xf32>
    %57 = arith.truncf %56 : vector<2x16x16xf32> to vector<2x16x16xbf16>
    %58 = arith.truncf %41 : vector<2x16x64xf32> to vector<2x16x64xbf16>
    "tpu.trace_start"() <{level = 10 : i32, message = "bqk,bkd->bqd"}> : () -> ()
    %cst_25 = arith.constant dense<0.000000e+00> : vector<2x16x64xf32>
    %59 = tpu.matmul %57, %58, %cst_25 {dimension_numbers = #tpu.dot_dimension_numbers<[2], [1], [1], [2], [0, 0, 0, 1, 1, 2], [0], [0]>} : vector<2x16x16xbf16>, vector<2x16x64xbf16>, vector<2x16x64xf32> -> vector<2x16x64xf32>
    "tpu.trace_stop"() : () -> ()
    %60 = vector.shape_cast %59 : vector<2x16x64xf32> to vector<32x64xf32>
    %61 = arith.truncf %60 : vector<32x64xf32> to vector<32x64xbf16>
    %c0_26 = arith.constant 0 : index
    %c0_27 = arith.constant 0 : index
    %62 = vector.load %arg8[%c0_26, %c0_27] : memref<64x64xbf16, #tpu.memory_space<vmem>>, vector<64x64xbf16>
    %cst_28 = arith.constant dense<0.000000e+00> : vector<32x64xf32>
    %63 = tpu.matmul %61, %62, %cst_28 {dimension_numbers = #tpu.dot_dimension_numbers<[1], [0], [0], [1], [0, 0, 1, 1], [], []>} : vector<32x64xbf16>, vector<64x64xbf16>, vector<32x64xf32> -> vector<32x64xf32>
    %c0_29 = arith.constant 0 : index
    %c0_30 = arith.constant 0 : index
    %64 = vector.load %arg9[%c0_29, %c0_30] : memref<1x64xf32, #tpu.memory_space<vmem>>, vector<1x64xf32>
    %65 = vector.broadcast %64 : vector<1x64xf32> to vector<32x64xf32>
    %66 = arith.addf %63, %65 : vector<32x64xf32>
    %67 = arith.addf %7, %66 : vector<32x64xf32>
    %cst_31 = arith.constant dense<0.000000e+00> : vector<32xf32>
    %68 = vector.multi_reduction <add>, %67, %cst_31 [1] : vector<32x64xf32> to vector<32xf32>
    %69 = vector.shape_cast %68 : vector<32xf32> to vector<32x1xf32>
    %cst_32 = arith.constant 6.400000e+01 : f32
    %70 = vector.broadcast %cst_32 : f32 to vector<32x1xf32>
    %71 = arith.divf %69, %70 : vector<32x1xf32>
    %72 = vector.broadcast %71 : vector<32x1xf32> to vector<32x64xf32>
    %73 = arith.subf %67, %72 : vector<32x64xf32>
    %74 = arith.mulf %73, %73 : vector<32x64xf32>
    %cst_33 = arith.constant dense<0.000000e+00> : vector<32xf32>
    %75 = vector.multi_reduction <add>, %74, %cst_33 [1] : vector<32x64xf32> to vector<32xf32>
    %76 = vector.shape_cast %75 : vector<32xf32> to vector<32x1xf32>
    %cst_34 = arith.constant 6.400000e+01 : f32
    %77 = vector.broadcast %cst_34 : f32 to vector<32x1xf32>
    %78 = arith.divf %76, %77 : vector<32x1xf32>
    %79 = vector.broadcast %71 : vector<32x1xf32> to vector<32x64xf32>
    %80 = arith.subf %67, %79 : vector<32x64xf32>
    %cst_35 = arith.constant 9.99999974E-6 : f32
    %81 = vector.broadcast %cst_35 : f32 to vector<32x1xf32>
    %82 = arith.addf %78, %81 : vector<32x1xf32>
    %83 = math.rsqrt %82 : vector<32x1xf32>
    %84 = vector.broadcast %83 : vector<32x1xf32> to vector<32x64xf32>
    %85 = arith.mulf %80, %84 : vector<32x64xf32>
    %c0_36 = arith.constant 0 : index
    %c0_37 = arith.constant 0 : index
    %86 = vector.load %arg10[%c0_36, %c0_37] : memref<1x64xf32, #tpu.memory_space<vmem>>, vector<1x64xf32>
    %87 = vector.broadcast %86 : vector<1x64xf32> to vector<32x64xf32>
    %88 = arith.mulf %85, %87 : vector<32x64xf32>
    %c0_38 = arith.constant 0 : index
    %c0_39 = arith.constant 0 : index
    %89 = vector.load %arg11[%c0_38, %c0_39] : memref<1x64xf32, #tpu.memory_space<vmem>>, vector<1x64xf32>
    %90 = vector.broadcast %89 : vector<1x64xf32> to vector<32x64xf32>
    %91 = arith.addf %88, %90 : vector<32x64xf32>
    %92 = arith.truncf %91 : vector<32x64xf32> to vector<32x64xbf16>
    %c0_40 = arith.constant 0 : index
    %c0_41 = arith.constant 0 : index
    %93 = vector.load %arg12[%c0_40, %c0_41] : memref<64x128xbf16, #tpu.memory_space<vmem>>, vector<64x128xbf16>
    %cst_42 = arith.constant dense<0.000000e+00> : vector<32x128xf32>
    %94 = tpu.matmul %92, %93, %cst_42 {dimension_numbers = #tpu.dot_dimension_numbers<[1], [0], [0], [1], [0, 0, 1, 1], [], []>} : vector<32x64xbf16>, vector<64x128xbf16>, vector<32x128xf32> -> vector<32x128xf32>
    %c0_43 = arith.constant 0 : index
    %c0_44 = arith.constant 0 : index
    %95 = vector.load %arg13[%c0_43, %c0_44] : memref<1x128xf32, #tpu.memory_space<vmem>>, vector<1x128xf32>
    %96 = vector.broadcast %95 : vector<1x128xf32> to vector<32x128xf32>
    %97 = arith.addf %94, %96 : vector<32x128xf32>
    %98 = arith.mulf %97, %97 : vector<32x128xf32>
    %99 = arith.mulf %97, %98 : vector<32x128xf32>
    %cst_45 = arith.constant 4.471500e-02 : f32
    %100 = vector.broadcast %cst_45 : f32 to vector<32x128xf32>
    %101 = arith.mulf %100, %99 : vector<32x128xf32>
    %102 = arith.addf %97, %101 : vector<32x128xf32>
    %cst_46 = arith.constant 0.797884583 : f32
    %103 = vector.broadcast %cst_46 : f32 to vector<32x128xf32>
    %104 = arith.mulf %103, %102 : vector<32x128xf32>
    %105 = math.tanh %104 : vector<32x128xf32>
    %cst_47 = arith.constant 1.000000e+00 : f32
    %106 = vector.broadcast %cst_47 : f32 to vector<32x128xf32>
    %107 = arith.addf %106, %105 : vector<32x128xf32>
    %cst_48 = arith.constant 5.000000e-01 : f32
    %108 = vector.broadcast %cst_48 : f32 to vector<32x128xf32>
    %109 = arith.mulf %108, %107 : vector<32x128xf32>
    %110 = arith.mulf %97, %109 : vector<32x128xf32>
    %111 = arith.truncf %110 : vector<32x128xf32> to vector<32x128xbf16>
    %c0_49 = arith.constant 0 : index
    %c0_50 = arith.constant 0 : index
    %112 = vector.load %arg14[%c0_49, %c0_50] : memref<128x64xbf16, #tpu.memory_space<vmem>>, vector<128x64xbf16>
    %cst_51 = arith.constant dense<0.000000e+00> : vector<32x64xf32>
    %113 = tpu.matmul %111, %112, %cst_51 {dimension_numbers = #tpu.dot_dimension_numbers<[1], [0], [0], [1], [0, 0, 1, 1], [], []>} : vector<32x128xbf16>, vector<128x64xbf16>, vector<32x64xf32> -> vector<32x64xf32>
    %c0_52 = arith.constant 0 : index
    %c0_53 = arith.constant 0 : index
    %114 = vector.load %arg15[%c0_52, %c0_53] : memref<1x64xf32, #tpu.memory_space<vmem>>, vector<1x64xf32>
    %115 = vector.broadcast %114 : vector<1x64xf32> to vector<32x64xf32>
    %116 = arith.addf %113, %115 : vector<32x64xf32>
    %117 = arith.addf %67, %116 : vector<32x64xf32>
    %118 = arith.truncf %117 : vector<32x64xf32> to vector<32x64xbf16>
    %c0_54 = arith.constant 0 : index
    %c0_55 = arith.constant 0 : index
    %119 = vector.load %arg16[%c0_54, %c0_55] : memref<64x32xbf16, #tpu.memory_space<vmem>>, vector<64x32xbf16>
    %cst_56 = arith.constant dense<0.000000e+00> : vector<32x32xf32>
    %120 = tpu.matmul %118, %119, %cst_56 {dimension_numbers = #tpu.dot_dimension_numbers<[1], [0], [0], [1], [0, 0, 1, 1], [], []>} : vector<32x64xbf16>, vector<64x32xbf16>, vector<32x32xf32> -> vector<32x32xf32>
    %c0_57 = arith.constant 0 : index
    %c0_58 = arith.constant 0 : index
    %121 = vector.load %arg17[%c0_57, %c0_58] : memref<1x32xf32, #tpu.memory_space<vmem>>, vector<1x32xf32>
    %122 = vector.broadcast %121 : vector<1x32xf32> to vector<32x32xf32>
    %123 = arith.addf %120, %122 : vector<32x32xf32>
    %c0_59 = arith.constant 0 : index
    %c0_60 = arith.constant 0 : index
    %124 = vector.load %arg18[%c0_59, %c0_60] : memref<1x32xf32, #tpu.memory_space<vmem>>, vector<1x32xf32>
    %125 = vector.broadcast %124 : vector<1x32xf32> to vector<32x32xf32>
    %126 = arith.addf %123, %125 : vector<32x32xf32>
    %c0_61 = arith.constant 0 : index
    %c0_62 = arith.constant 0 : index
    %127 = vector.load %arg19[%c0_61, %c0_62] : memref<32x32xf32, #tpu.memory_space<vmem>>, vector<32x32xf32>
    %128 = arith.addf %126, %127 : vector<32x32xf32>
    %c0_63 = arith.constant 0 : index
    %c0_64 = arith.constant 0 : index
    %129 = vector.load %arg20[%c0_63, %c0_64] : memref<16x32xf32, #tpu.memory_space<vmem>>, vector<16x32xf32>
    %130 = arith.truncf %129 : vector<16x32xf32> to vector<16x32xbf16>
    %c0_65 = arith.constant 0 : index
    %c0_66 = arith.constant 0 : index
    %131 = vector.load %arg21[%c0_65, %c0_66] : memref<32x32xbf16, #tpu.memory_space<vmem>>, vector<32x32xbf16>
    %cst_67 = arith.constant dense<0.000000e+00> : vector<16x32xf32>
    %132 = tpu.matmul %130, %131, %cst_67 {dimension_numbers = #tpu.dot_dimension_numbers<[1], [0], [0], [1], [0, 0, 1, 1], [], []>} : vector<16x32xbf16>, vector<32x32xbf16>, vector<16x32xf32> -> vector<16x32xf32>
    %c0_68 = arith.constant 0 : index
    %c0_69 = arith.constant 0 : index
    %133 = vector.load %arg22[%c0_68, %c0_69] : memref<1x32xf32, #tpu.memory_space<vmem>>, vector<1x32xf32>
    %134 = vector.broadcast %133 : vector<1x32xf32> to vector<16x32xf32>
    %135 = arith.addf %132, %134 : vector<16x32xf32>
    %136 = vector.shape_cast %135 : vector<16x32xf32> to vector<2x8x32xf32>
    %137 = arith.truncf %128 : vector<32x32xf32> to vector<32x32xbf16>
    %c0_70 = arith.constant 0 : index
    %c0_71 = arith.constant 0 : index
    %138 = vector.load %arg23[%c0_70, %c0_71] : memref<32x32xbf16, #tpu.memory_space<vmem>>, vector<32x32xbf16>
    %cst_72 = arith.constant dense<0.000000e+00> : vector<32x32xf32>
    %139 = tpu.matmul %137, %138, %cst_72 {dimension_numbers = #tpu.dot_dimension_numbers<[1], [0], [0], [1], [0, 0, 1, 1], [], []>} : vector<32x32xbf16>, vector<32x32xbf16>, vector<32x32xf32> -> vector<32x32xf32>
    %c0_73 = arith.constant 0 : index
    %c0_74 = arith.constant 0 : index
    %140 = vector.load %arg24[%c0_73, %c0_74] : memref<1x32xf32, #tpu.memory_space<vmem>>, vector<1x32xf32>
    %141 = vector.broadcast %140 : vector<1x32xf32> to vector<32x32xf32>
    %142 = arith.addf %139, %141 : vector<32x32xf32>
    %143 = vector.shape_cast %142 : vector<32x32xf32> to vector<2x16x32xf32>
    %144 = arith.truncf %126 : vector<32x32xf32> to vector<32x32xbf16>
    %c0_75 = arith.constant 0 : index
    %c0_76 = arith.constant 0 : index
    %145 = vector.load %arg25[%c0_75, %c0_76] : memref<32x32xbf16, #tpu.memory_space<vmem>>, vector<32x32xbf16>
    %cst_77 = arith.constant dense<0.000000e+00> : vector<32x32xf32>
    %146 = tpu.matmul %144, %145, %cst_77 {dimension_numbers = #tpu.dot_dimension_numbers<[1], [0], [0], [1], [0, 0, 1, 1], [], []>} : vector<32x32xbf16>, vector<32x32xbf16>, vector<32x32xf32> -> vector<32x32xf32>
    %c0_78 = arith.constant 0 : index
    %c0_79 = arith.constant 0 : index
    %147 = vector.load %arg26[%c0_78, %c0_79] : memref<1x32xf32, #tpu.memory_space<vmem>>, vector<1x32xf32>
    %148 = vector.broadcast %147 : vector<1x32xf32> to vector<32x32xf32>
    %149 = arith.addf %146, %148 : vector<32x32xf32>
    %150 = vector.shape_cast %149 : vector<32x32xf32> to vector<2x16x32xf32>
    %cst_80 = arith.constant 0.176776692 : f32
    %151 = vector.broadcast %cst_80 : f32 to vector<2x8x32xf32>
    %152 = arith.mulf %136, %151 : vector<2x8x32xf32>
    %153 = arith.truncf %152 : vector<2x8x32xf32> to vector<2x8x32xbf16>
    %154 = arith.truncf %143 : vector<2x16x32xf32> to vector<2x16x32xbf16>
    "tpu.trace_start"() <{level = 10 : i32, message = "bqd,bkd->bqk"}> : () -> ()
    %cst_81 = arith.constant dense<0.000000e+00> : vector<2x8x16xf32>
    %155 = tpu.matmul %153, %154, %cst_81 {dimension_numbers = #tpu.dot_dimension_numbers<[2], [2], [1], [1], [0, 0, 0, 1, 1, 1], [0], [0]>} : vector<2x8x32xbf16>, vector<2x16x32xbf16>, vector<2x8x16xf32> -> vector<2x8x16xf32>
    "tpu.trace_stop"() : () -> ()
    %cst_82 = arith.constant dense<0xFF800000> : vector<2x8xf32>
    %156 = vector.multi_reduction <maximumf>, %155, %cst_82 [2] : vector<2x8x16xf32> to vector<2x8xf32>
    %157 = vector.shape_cast %156 : vector<2x8xf32> to vector<2x8x1xf32>
    %158 = vector.broadcast %157 : vector<2x8x1xf32> to vector<2x8x16xf32>
    %159 = arith.subf %155, %158 : vector<2x8x16xf32>
    %160 = math.exp %159 : vector<2x8x16xf32>
    %cst_83 = arith.constant dense<0.000000e+00> : vector<2x8xf32>
    %161 = vector.multi_reduction <add>, %160, %cst_83 [2] : vector<2x8x16xf32> to vector<2x8xf32>
    %162 = vector.shape_cast %161 : vector<2x8xf32> to vector<2x8x1xf32>
    %163 = tpu.reciprocal %162 {approx = true} : vector<2x8x1xf32> -> vector<2x8x1xf32>
    %164 = vector.broadcast %163 : vector<2x8x1xf32> to vector<2x8x16xf32>
    %165 = arith.mulf %160, %164 : vector<2x8x16xf32>
    %166 = arith.truncf %165 : vector<2x8x16xf32> to vector<2x8x16xbf16>
    %167 = arith.truncf %150 : vector<2x16x32xf32> to vector<2x16x32xbf16>
    "tpu.trace_start"() <{level = 10 : i32, message = "bqk,bkd->bqd"}> : () -> ()
    %cst_84 = arith.constant dense<0.000000e+00> : vector<2x8x32xf32>
    %168 = tpu.matmul %166, %167, %cst_84 {dimension_numbers = #tpu.dot_dimension_numbers<[2], [1], [1], [2], [0, 0, 0, 1, 1, 2], [0], [0]>} : vector<2x8x16xbf16>, vector<2x16x32xbf16>, vector<2x8x32xf32> -> vector<2x8x32xf32>
    "tpu.trace_stop"() : () -> ()
    %169 = vector.shape_cast %168 : vector<2x8x32xf32> to vector<16x32xf32>
    %170 = arith.truncf %169 : vector<16x32xf32> to vector<16x32xbf16>
    %c0_85 = arith.constant 0 : index
    %c0_86 = arith.constant 0 : index
    %171 = vector.load %arg27[%c0_85, %c0_86] : memref<32x32xbf16, #tpu.memory_space<vmem>>, vector<32x32xbf16>
    %cst_87 = arith.constant dense<0.000000e+00> : vector<16x32xf32>
    %172 = tpu.matmul %170, %171, %cst_87 {dimension_numbers = #tpu.dot_dimension_numbers<[1], [0], [0], [1], [0, 0, 1, 1], [], []>} : vector<16x32xbf16>, vector<32x32xbf16>, vector<16x32xf32> -> vector<16x32xf32>
    %c0_88 = arith.constant 0 : index
    %c0_89 = arith.constant 0 : index
    %173 = vector.load %arg28[%c0_88, %c0_89] : memref<1x32xf32, #tpu.memory_space<vmem>>, vector<1x32xf32>
    %174 = vector.broadcast %173 : vector<1x32xf32> to vector<16x32xf32>
    %175 = arith.addf %172, %174 : vector<16x32xf32>
    %176 = arith.addf %129, %175 : vector<16x32xf32>
    %177 = vector.shape_cast %176 : vector<16x32xf32> to vector<2x8x32xf32>
    %178 = vector.extract_strided_slice %177 {offsets = [0, 1, 0], sizes = [2, 1, 32], strides = [1, 1, 1]} : vector<2x8x32xf32> to vector<2x1x32xf32>
    %179 = vector.shape_cast %178 : vector<2x1x32xf32> to vector<2x32xf32>
    %180 = arith.truncf %179 : vector<2x32xf32> to vector<2x32xbf16>
    %c0_90 = arith.constant 0 : index
    %c0_91 = arith.constant 0 : index
    %181 = vector.load %arg29[%c0_90, %c0_91] : memref<32x32xbf16, #tpu.memory_space<vmem>>, vector<32x32xbf16>
    %cst_92 = arith.constant dense<0.000000e+00> : vector<2x32xf32>
    %182 = tpu.matmul %180, %181, %cst_92 {dimension_numbers = #tpu.dot_dimension_numbers<[1], [0], [0], [1], [0, 0, 1, 1], [], []>} : vector<2x32xbf16>, vector<32x32xbf16>, vector<2x32xf32> -> vector<2x32xf32>
    %c0_93 = arith.constant 0 : index
    %c0_94 = arith.constant 0 : index
    %183 = vector.load %arg30[%c0_93, %c0_94] : memref<1x32xf32, #tpu.memory_space<vmem>>, vector<1x32xf32>
    %184 = vector.broadcast %183 : vector<1x32xf32> to vector<2x32xf32>
    %185 = arith.addf %182, %184 : vector<2x32xf32>
    %cst_95 = arith.constant 0.000000e+00 : f32
    %186 = vector.broadcast %cst_95 : f32 to vector<2x32xf32>
    %187 = arith.maximumf %185, %186 : vector<2x32xf32>
    %188 = arith.truncf %187 : vector<2x32xf32> to vector<2x32xbf16>
    %c0_96 = arith.constant 0 : index
    %c0_97 = arith.constant 0 : index
    %189 = vector.load %arg31[%c0_96, %c0_97] : memref<32x8xbf16, #tpu.memory_space<vmem>>, vector<32x8xbf16>
    %cst_98 = arith.constant dense<0.000000e+00> : vector<2x8xf32>
    %190 = tpu.matmul %188, %189, %cst_98 {dimension_numbers = #tpu.dot_dimension_numbers<[1], [0], [0], [1], [0, 0, 1, 1], [], []>} : vector<2x32xbf16>, vector<32x8xbf16>, vector<2x8xf32> -> vector<2x8xf32>
    %c0_99 = arith.constant 0 : index
    %c0_100 = arith.constant 0 : index
    %191 = vector.load %arg32[%c0_99, %c0_100] : memref<1x8xf32, #tpu.memory_space<vmem>>, vector<1x8xf32>
    %192 = vector.broadcast %191 : vector<1x8xf32> to vector<2x8xf32>
    %193 = arith.addf %190, %192 : vector<2x8xf32>
    %194 = arith.truncf %126 : vector<32x32xf32> to vector<32x32xbf16>
    %c0_101 = arith.constant 0 : index
    %c0_102 = arith.constant 0 : index
    %195 = vector.load %arg33[%c0_101, %c0_102] : memref<32x8xbf16, #tpu.memory_space<vmem>>, vector<32x8xbf16>
    %cst_103 = arith.constant dense<0.000000e+00> : vector<32x8xf32>
    %196 = tpu.matmul %194, %195, %cst_103 {dimension_numbers = #tpu.dot_dimension_numbers<[1], [0], [0], [1], [0, 0, 1, 1], [], []>} : vector<32x32xbf16>, vector<32x8xbf16>, vector<32x8xf32> -> vector<32x8xf32>
    %c0_104 = arith.constant 0 : index
    %c0_105 = arith.constant 0 : index
    %197 = vector.load %arg34[%c0_104, %c0_105] : memref<1x8xf32, #tpu.memory_space<vmem>>, vector<1x8xf32>
    %198 = vector.broadcast %197 : vector<1x8xf32> to vector<32x8xf32>
    %199 = arith.addf %196, %198 : vector<32x8xf32>
    %200 = vector.shape_cast %199 : vector<32x8xf32> to vector<2x16x8xf32>
    %201 = vector.shape_cast %193 : vector<2x8xf32> to vector<2x1x8xf32>
    "tpu.trace_start"() <{level = 10 : i32, message = "bqd,bkd->bqk"}> : () -> ()
    %cst_106 = arith.constant dense<0.000000e+00> : vector<2x1x16xf32>
    %202 = tpu.matmul %201, %200, %cst_106 {dimension_numbers = #tpu.dot_dimension_numbers<[2], [2], [1], [1], [0, 0, 0, 1, 1, 1], [0], [0]>} : vector<2x1x8xf32>, vector<2x16x8xf32>, vector<2x1x16xf32> -> vector<2x1x16xf32>
    "tpu.trace_stop"() : () -> ()
    %c0_107 = arith.constant 0 : index
    %c0_108 = arith.constant 0 : index
    %c0_109 = arith.constant 0 : index
    %203 = vector.load %arg35[%c0_107, %c0_108, %c0_109] : memref<2x1x16xf32, #tpu.memory_space<vmem>>, vector<2x1x16xf32>
    tpu.vector_store %arg35[%c0_107, %c0_108, %c0_109], %202 {strides = array<i32>} : memref<2x1x16xf32, #tpu.memory_space<vmem>>, vector<2x1x16xf32>,
    return
  }
}

</mosaic_0001>

<bundles_post_ra>
// kernel: repsam_forward.1
= control target key start
LH: loop header
LB: loop body
LE: loop exit
PB: predicated region body
PF: predicated region fallthrough
CT: control target
= control target key end

     0   :  { %v2775_v0 = vmov 0   ;;  %s2776_s3 = smov 3   ;;  %s2777_s10 = smov 1   ;;  %vm275_vm0 = vcmask 523264   ;;  %vm2784_vm1 = vmmov 0   ;;  %vm635_vm2 = vcmask 130048   ;;  %s3171_s0 = inlined_call_operand.smem [shape: u32[36], index: -1, kind: input, shape index: {}] }
   0x1   :  { %282 = vmatprep.subr.bf16.mxu0 %v2775_v0  ;;  %s2825_s6 = sld [smem:[%s3171_s0 + %s2776_s3]]   ;;  %506 = vmatprep.mubr.bf16.mxu1 %v2775_v0  ;;  %s2778_s14 = smov 2   ;;  %vm1345_vm3 = vcmask 261120   ;;  %vm1848_vm4 = vcmask 1041409   ;;  %vm2069_vm5 = vcmask 64512   ;;  %vm2226_vm7 = vcmask 122880  }
   0x2   :  { %s2834_s9 = sld [smem:[%s3171_s0]]   ;;  %s2779_s18 = smov 6   ;;  %vm2622_vm6 = vmpackc.low %vm2069_vm5, %vm2069_vm5 }
   0x3   :  { %s2839_s13 = sld [smem:[%s3171_s0 + %s2777_s10]]   ;;  %s2780_s22 = smov 4  }
   0x4   :  { %s2234_s17 = sld [smem:[%s3171_s0 + %s2778_s14]]   ;;  %s2781_s26 = smov 5  }
   0x5   :  { %s2238_s21 = sld [smem:[%s3171_s0 + %s2779_s18]]   ;;  %s2782_s30 = smov 7  }
   0x6   :  { %s2236_s25 = sld [smem:[%s3171_s0 + %s2780_s22]]   ;;  %s2785_s4 = smov 64  }
   0x7   :  { %v2669_v1 = vld [vmem:[%s2825_s6] sm:$0xff]   ;;  %v2670_v2 = vld [vmem:[%s2825_s6 + $0x8] sm:$0xff]   ;;  %v2671_v3 = vld [vmem:[%s2825_s6 + $0x10] sm:$0xff]   ;;  %s2237_s29 = sld [smem:[%s3171_s0 + %s2781_s26]]   ;;  %s2786_s5 = smov 8  }
   0x8   :  { %283 = vmatpush1.bf16.msra.mxu0 %v2669_v1  ;;  %v2672_v4 = vld [vmem:[%s2825_s6 + $0x18] sm:$0xff]   ;;  %v148_v5 = vld [vmem:[%s2834_s9 + $0x8] sm:$0xff]  ;;  %v2673_v10 = vld [vmem:[%s2825_s6 + $0x20] sm:$0xff]   ;;  %s2239_s3 = sld [smem:[%s3171_s0 + %s2782_s30]]   ;;  %s2794_s7 = smov 21  }
   0x9   :  { %284 = vmatprep.subr.bf16.mxu0 %v2775_v0  ;;  %v150_v6 = vld [vmem:[%s2834_s9 + $0x18] sm:$0xff]  ;;  %v156_v7 = vld [vmem:[%s2839_s13 + $0x8] sm:$0xff]  ;;  %v2675_v14 = vld [vmem:[%s2825_s6 + $0x30] sm:$0xff]   ;;  %s2956_s8 = sld [smem:[%s3171_s0 + %s2786_s5]]   ;;  %s2795_s11 = smov 15  }
   0xa   :  { %v158_v8 = vld [vmem:[%s2839_s13 + $0x18] sm:$0xff]  ;;  %v164_v9 = vadd.f32 %v156_v7, %v148_v5  ;;  %v2674_v13 = vld [vmem:[%s2825_s6 + $0x28] sm:$0xff]   ;;  %v2677_v16 = vld [vmem:[%s2825_s6 + $0x40] sm:$0xff]   ;;  %s3032_s10 = sld [smem:[%s3171_s0 + %s2794_s7]]   ;;  %s2796_s15 = smov 20  }
   0xb   :  { %v166_v11 = vadd.f32 %v158_v8, %v150_v6  ;;  %v2676_v15 = vld [vmem:[%s2825_s6 + $0x38] sm:$0xff]   ;;  %v2678_v17 = vld [vmem:[%s2825_s6 + $0x48] sm:$0xff]   ;;  %v2679_v18 = vld [vmem:[%s2825_s6 + $0x50] sm:$0xff]   ;;  %s2247_s14 = sld [smem:[%s3171_s0 + %s2795_s11]]   ;;  %s2797_s19 = smov 25  }
   0xc   :  { %285 = vmatpush1.bf16.msra.mxu0 %v2670_v2  ;;  %v147_v19 = vld [vmem:[%s2834_s9] sm:$0xff]  ;;  %v149_v20 = vld [vmem:[%s2834_s9 + $0x10] sm:$0xff]  ;;  %v152_v23 = vld [vmem:[%s2834_s9 + $0x28] sm:$0xff]  ;;  %s2252_s18 = sld [smem:[%s3171_s0 + %s2796_s15]]   ;;  %s2798_s23 = smov 23  }
   0xd   :  { %286 = vmatprep.subr.bf16.mxu0 %v2775_v0  ;;  %v172_v12 = vpack.c.bf16 %v166_v11, %v164_v9  ;;  %v155_v21 = vld [vmem:[%s2839_s13] sm:$0xff]  ;;  %v157_v22 = vld [vmem:[%s2839_s13 + $0x10] sm:$0xff]  ;;  %v154_v24 = vld [vmem:[%s2834_s9 + $0x38] sm:$0xff]  ;;  %s2257_s22 = sld [smem:[%s3171_s0 + %s2797_s19]]   ;;  %s2799_s27 = smov 17  }
   0xe   :  { %v160_v25 = vld [vmem:[%s2839_s13 + $0x28] sm:$0xff]  ;;  %v162_v26 = vld [vmem:[%s2839_s13 + $0x38] sm:$0xff]  ;;  %v163_v27 = vadd.f32 %v155_v21, %v147_v19  ;;  %v165_v28 = vadd.f32 %v157_v22, %v149_v20  ;;  %v151_v33 = vld [vmem:[%s2834_s9 + $0x20] sm:$0xff]  ;;  %s2255_s26 = sld [smem:[%s3171_s0 + %s2798_s23]]   ;;  %s2800_s1 = smov 18  }
   0xf   :  { %2280 = vmatprep.mubr.msk.bf16.mxu0 %vm275_vm0, %v172_v12  ;;  %v2680_v29 = vld [vmem:[%s2825_s6 + $0x58] sm:$0xff]   ;;  %v168_v30 = vadd.f32 %v160_v25, %v152_v23  ;;  %v170_v31 = vadd.f32 %v162_v26, %v154_v24  ;;  %v153_v35 = vld [vmem:[%s2834_s9 + $0x30] sm:$0xff]  ;;  %v159_v36 = vld [vmem:[%s2839_s13 + $0x20] sm:$0xff]  ;;  %s2787_s9 = smov 9   ;;  %s2249_s30 = sld [smem:[%s3171_s0 + %s2799_s27]]  }
  0x10   :  { %287 = vmatpush1.bf16.msra.mxu0 %v2671_v3  ;;  %v171_v32 = vpack.c.bf16 %v165_v28, %v163_v27  ;;  %v161_v37 = vld [vmem:[%s2839_s13 + $0x30] sm:$0xff]  ;;  %v167_v38 = vadd.f32 %v159_v36, %v151_v33  ;;  %v199_v41 = vld [vmem:[%s2234_s17] sm:$0xff]  ;;  %v200_v43 = vld [vmem:[%s2234_s17 + $0x8] sm:$0xff]  ;;  %s2241_s12 = sld [smem:[%s3171_s0 + %s2787_s9]]   ;;  %s2788_s13 = smov 12  }
  0x11   :  { %288 = vmatprep.subr.bf16.mxu0 %v2775_v0  ;;  %v174_v34 = vpack.c.bf16 %v170_v31, %v168_v30  ;;  %v169_v39 = vadd.f32 %v161_v37, %v153_v35  ;;  %v201_v50 = vld [vmem:[%s2234_s17 + $0x10] sm:$0xff]  ;;  %v202_v53 = vld [vmem:[%s2234_s17 + $0x18] sm:$0xff]  ;;  %v2683_v19 = vld [vmem:[%s2238_s21] ss:$8 sps:$4 sm:$0xff]   ;;  %s2244_s16 = sld [smem:[%s3171_s0 + %s2788_s13]]   ;;  %s2789_s17 = smov 10  }
  0x12   :  { %v2684_v20 = vld [vmem:[%s2238_s21 + $0x14] ss:$8 sps:$4 sm:$0xff]   ;;  %v2686_v21 = vld [vmem:[%s2238_s21 + $0x10] ss:$8 sps:$4 sm:$0xff]   ;;  %v2687_v22 = vld [vmem:[%s2238_s21 + $0x24] ss:$8 sps:$4 sm:$0xff]   ;;  %s2242_s20 = sld [smem:[%s3171_s0 + %s2789_s17]]  }
  0x13   :  { %v173_v40 = vpack.c.bf16 %v169_v39, %v167_v38  ;;  %v2689_v23 = vld [vmem:[%s2238_s21 + $0x20] ss:$8 sps:$4 sm:$0xff]   ;;  %v2690_v24 = vld [vmem:[%s2238_s21 + $0x34] ss:$8 sps:$4 sm:$0xff]   ;;  %v2692_v25 = vld [vmem:[%s2238_s21 + $0x30] ss:$8 sps:$4 sm:$0xff]  }
  0x14   :  { %289 = vmatpush1.bf16.msra.mxu0 %v2672_v4  ;;  %s2801_s5 = smov 19   ;;  %s2802_s9 = smov 26  }
  0x15   :  { %290 = vmatprep.subr.bf16.mxu0 %v2775_v0  ;;  %s2803_s13 = smov 22   ;;  %s2804_s17 = smov 24  }
  0x16   :  { %s2809_s7 = smov 31   ;;  %s2811_s11 = smov 30  }
  0x17   :  { %s2812_s15 = smov 34   ;;  %s2813_s19 = smov 32  }
  0x18   :  { %291 = vmatpush1.bf16.msra.mxu0 %v2673_v10  ;;  %s2815_s23 = smov 35  }
  0x19   :  { %292 = vmatprep.subr.bf16.mxu0 %v2775_v0 }
  0x1c   :  { %293 = vmatpush1.bf16.msra.mxu0 %v2674_v13 }
  0x1d   :  { %294 = vmatprep.subr.bf16.mxu0 %v2775_v0 }
  0x20   :  { %295 = vmatpush1.bf16.msra.mxu0 %v2675_v14 }
  0x21   :  { %296 = vmatprep.subr.bf16.mxu0 %v2775_v0 }
  0x24   :  { %297 = vmatpush1.bf16.msra.mxu0 %v2676_v15 }
  0x25   :  { %298 = vmatprep.subr.bf16.mxu0 %v2775_v0 }
  0x28   :  { %299 = vmatpush1.bf16.msra.mxu0 %v2677_v16 }
  0x29   :  { %300 = vmatprep.subr.bf16.mxu0 %v2775_v0 }
  0x2c   :  { %301 = vmatpush1.bf16.msra.mxu0 %v2678_v17 }
  0x2d   :  { %302 = vmatprep.subr.bf16.mxu0 %v2775_v0 }
  0x30   :  { %303 = vmatpush1.bf16.msra.mxu0 %v2679_v18  ;;  %v2681_v18 = vld [vmem:[%s2238_s21 + $0x4] ss:$8 sps:$4 sm:$0xff]   ;;  %s2790_s21 = smov 11  }
  0x31   :  { %304 = vmatprep.subr.bf16.mxu0 %v2775_v0  ;;  %474 = vmatprep.subr.bf16.mxu1 %v2681_v18  ;;  %s2243_s24 = sld [smem:[%s3171_s0 + %s2790_s21]]   ;;  %s2805_s21 = smov 27  }
  0x32   :  { %475 = vmatpush1.bf16.msra.mxu1 %v2683_v19 }
  0x33   :  { %476 = vmatprep.subr.bf16.mxu1 %v2684_v20 }
  0x34   :  { %305 = vmatpush1.bf16.msra.mxu0 %v2680_v29 }
  0x36   :  { %477 = vmatpush1.bf16.msra.mxu1 %v2686_v21 }
  0x37   :  { %315 = vmatmul.mubr.bf16.vlgmr.msra.gmra.mrb[0].mxu0 %v171_v32  ;;  %478 = vmatprep.subr.bf16.mxu1 %v2687_v22 }
  0x38   :  { %2281 = vmatprep.mubr.msk.bf16.mxu0 %vm275_vm0, %v174_v34 }
  0x3a   :  { %479 = vmatpush1.bf16.msra.mxu1 %v2689_v23 }
  0x3b   :  { %480 = vmatprep.subr.bf16.mxu1 %v2690_v24 }
  0x3e   :  { %481 = vmatpush1.bf16.msra.mxu1 %v2692_v25 }
  0x3f   :  { %323 = vmatmul.mubr.bf16.gmra.mrb[4].mxu0 %v173_v40  ;;  %v2282_v40 = vld [vmem:[%s2236_s25] ss:$0 sm:$0xff]  ;;  %s2791_s25 = smov 14  }
  0x40   :  { %s2246_s28 = sld [smem:[%s3171_s0 + %s2791_s25]]   ;;  %s2806_s25 = smov 29  }
 0x10a   :  { %v316_v42 = vpop.f32.mrb[0].mxu0 }
 0x10b   :  { %v2882_v44 = vadd.f32 %v316_v42, %v199_v41  ;;  %v318_v45 = vpop.f32.mrb[1].mxu0 }
 0x10c   :  { %v319_v46 = vpop.f32.mrb[2].mxu0  ;;  %v2283_v45 = vld [vmem:[%s2237_s29] ss:$0 sm:$0xff]  ;;  %s2792_s29 = smov 16  }
 0x10d   :  { %v2884_v47 = vadd.f32 %v319_v46, %v200_v43  ;;  %v321_v48 = vpop.f32.mrb[3].mxu0  ;;  %v331_v49 = vsel %vm275_vm0, %v2882_v44, 0.0  ;;  %s3019_s2 = sld [smem:[%s3171_s0 + %s2792_s29]]   ;;  %s2807_s29 = smov 33  }
 0x10e   :  { %332 = vadd.xlane.f32.xlu0 %v331_v49 }
 0x10f   :  { %v334_v51 = vsel %vm275_vm0, %v2884_v47, 0.0 }
 0x112   :  { %v324_v52 = vpop.f32.mrb[4].mxu0  ;;  %335 = vadd.xlane.f32.xlu0 %v334_v51 }
 0x113   :  { %v2890_v54 = vadd.f32 %v324_v52, %v201_v50  ;;  %v326_v55 = vpop.f32.mrb[5].mxu0 }
 0x114   :  { %v327_v56 = vpop.f32.mrb[6].mxu0 }
 0x115   :  { %v2892_v57 = vadd.f32 %v327_v56, %v202_v53  ;;  %v337_v58 = vsel %vm275_vm0, %v2890_v54, 0.0  ;;  %v329_v59 = vpop.f32.mrb[7].mxu0 }
 0x116   :  { %338 = vadd.xlane.f32.xlu1 %v337_v58 }
 0x117   :  { %v340_v60 = vsel %vm275_vm0, %v2892_v57, 0.0 }
 0x11a   :  { %341 = vadd.xlane.f32.xlu1 %v340_v60 }
 0x19b   :  { %v333_v61 = vpop.xlane.xlu0 %332 }
 0x19c   :  { %v344_v62 = vmul.f32 0.015625, %v333_v61 }
 0x19e   :  { %v348_v63 = vsub.f32 %v2882_v44, %v344_v62  ;;  %v418_v62 = vlaneseq }
 0x19f   :  { %v336_v1 = vpop.xlane.xlu0 %335 }
 0x1a0   :  { %v345_v2 = vmul.f32 0.015625, %v336_v1  ;;  %v352_v3 = vmul.f32 %v348_v63, %v348_v63 }
 0x1a2   :  { %v349_v4 = vsub.f32 %v2884_v47, %v345_v2  ;;  %v356_v5 = vsel %vm275_vm0, %v352_v3, 0.0  ;;  %v416_v2 = vld [vmem:[%s2239_s3] sm:$0x3]  ;;  %v2783_v3 = vmov 0.0   ;;  %s2793_s3 = smov 13  }
 0x1a3   :  { %v339_v6 = vpop.xlane.xlu1 %338  ;;  %357 = vadd.xlane.f32.xlu0 %v356_v5  ;;  %2446 = vmatprep.subr.bf16.mxu1 %v2783_v3  ;;  %s2245_s6 = sld [smem:[%s3171_s0 + %s2793_s3]]   ;;  %s2808_s3 = smov 28  }
 0x1a4   :  { %v346_v7 = vmul.f32 0.015625, %v339_v6  ;;  %v353_v8 = vmul.f32 %v349_v4, %v349_v4 }
 0x1a6   :  { %v350_v9 = vsub.f32 %v2890_v54, %v346_v7  ;;  %v359_v10 = vsel %vm275_vm0, %v353_v8, 0.0 }
 0x1a7   :  { %v342_v11 = vpop.xlane.xlu1 %341  ;;  %360 = vadd.xlane.f32.xlu1 %v359_v10 }
 0x1a8   :  { %v347_v12 = vmul.f32 0.015625, %v342_v11  ;;  %v354_v13 = vmul.f32 %v350_v9, %v350_v9 }
 0x1aa   :  { %v351_v14 = vsub.f32 %v2892_v57, %v347_v12  ;;  %v362_v15 = vsel %vm275_vm0, %v354_v13, 0.0 }
 0x1ab   :  { %363 = vadd.xlane.f32.xlu0 %v362_v15 }
 0x1ac   :  { %v355_v16 = vmul.f32 %v351_v14, %v351_v14 }
 0x1ae   :  { %v365_v17 = vsel %vm275_vm0, %v355_v16, 0.0 }
 0x1af   :  { %366 = vadd.xlane.f32.xlu1 %v365_v17 }
 0x230   :  { %v358_v26 = vpop.xlane.xlu0 %357 }
 0x231   :  { %v368_v27 = vmul.f32 0.015625, %v358_v26 }
 0x233   :  { %v372_v28 = vadd.f32 1e-05, %v368_v27 }
 0x234   :  { %v361_v29 = vpop.xlane.xlu1 %360 }
 0x235   :  { %2727 = vrsqrt.f32 %v372_v28  ;;  %v369_v30 = vmul.f32 0.015625, %v361_v29 }
 0x237   :  { %v373_v31 = vadd.f32 1e-05, %v369_v30 }
 0x238   :  { %v364_v32 = vpop.xlane.xlu0 %363 }
 0x239   :  { %2729 = vrsqrt.f32 %v373_v31  ;;  %v370_v33 = vmul.f32 0.015625, %v364_v32 }
 0x23b   :  { %v374_v34 = vadd.f32 1e-05, %v370_v33 }
 0x23c   :  { %v367_v35 = vpop.xlane.xlu1 %366 }
 0x23d   :  { %2731 = vrsqrt.f32 %v374_v34  ;;  %v371_v36 = vmul.f32 0.015625, %v367_v35 }
 0x23f   :  { %v2728_v37 = vpop.eup %2727  ;;  %v375_v38 = vadd.f32 1e-05, %v371_v36 }
 0x240   :  { %v380_v39 = vmul.f32 %v2728_v37, %v348_v63  ;;  %v2921_v63 = vshrl.u32 %v418_v62, 7 }
 0x241   :  { %2733 = vrsqrt.f32 %v375_v38 }
 0x242   :  { %v391_v43 = vmul.f32 %v2282_v40, %v380_v39  ;;  %v420_v1 = vsub.s32 0, %v2921_v63 }
 0x243   :  { %v2730_v41 = vpop.eup %2729 }
 0x244   :  { %v381_v42 = vmul.f32 %v2730_v41, %v349_v4  ;;  %v402_v50 = vadd.f32 %v2283_v45, %v391_v43  ;;  %v421_v4 = vrot.slane %v416_v2, %v420_v1 }
 0x246   :  { %v392_v46 = vmul.f32 %v2282_v40, %v381_v42 }
 0x247   :  { %v2732_v48 = vpop.eup %2731 }
 0x248   :  { %v382_v49 = vmul.f32 %v2732_v48, %v350_v9  ;;  %v403_v51 = vadd.f32 %v2283_v45, %v392_v46 }
 0x24a   :  { %v406_v52 = vpack.c.bf16 %v403_v51, %v402_v50  ;;  %v393_v56 = vmul.f32 %v2282_v40, %v382_v49 }
 0x24b   :  { %v2734_v53 = vpop.eup %2733 }
 0x24c   :  { %v383_v55 = vmul.f32 %v2734_v53, %v351_v14  ;;  %2292 = vmatmul.mubr.msk.bf16.vlgmr.msra.gmra.mrb[0].mxu1 %vm275_vm0, %v406_v52  ;;  %v404_v59 = vadd.f32 %v2283_v45, %v393_v56 }
 0x24d   :  { %516 = vmatprep.mubr.bf16.mxu1 %v2775_v0  ;;  %v424_v0 = vsub.s32 1, %v2921_v63 }
 0x24e   :  { %v394_v58 = vmul.f32 %v2282_v40, %v383_v55 }
 0x24f   :  { %v425_v6 = vrot.slane %v416_v2, %v424_v0 }
 0x250   :  { %v405_v60 = vadd.f32 %v2283_v45, %v394_v58 }
 0x252   :  { %v407_v61 = vpack.c.bf16 %v405_v60, %v404_v59 }
 0x254   :  { %2293 = vmatmul.mubr.msk.bf16.gmra.mrb[4].mxu1 %vm275_vm0, %v407_v61 }
 0x255   :  { %2448 = vmatprep.mubr.msk.bf16.mxu1 %vm2784_vm1, %v2783_v3 }
 0x31f   :  { %v508_v5 = vpop.f32.mrb[0].mxu1 }
 0x320   :  { %v509_v7 = vadd.f32 %v508_v5, %v421_v4  ;;  %v510_v8 = vpop.f32.mrb[1].mxu1 }
 0x321   :  { %v512_v9 = vpop.f32.mrb[2].mxu1  ;;  %v511_v12 = vadd.f32 %v510_v8, %v425_v6 }
 0x322   :  { %v513_v10 = vadd.f32 %v512_v9, %v421_v4  ;;  %v514_v11 = vpop.f32.mrb[3].mxu1  ;;  %v527_v14 = vmul.f32 0.125, %v509_v7 }
 0x323   :  { %v515_v13 = vadd.f32 %v514_v11, %v425_v6 }
 0x324   :  { %v528_v15 = vmul.f32 0.125, %v513_v10  ;;  %v533_v16 = vpack.c.bf16 %v513_v10, %v509_v7  ;;  %v2693_v10 = vld [vmem:[%s2956_s8] sm:$0xff]  }
 0x325   :  { %v682_v17 = vpack.c.bf16 %v515_v13, %v511_v12  ;;  %2470 = vmatprep.subr.bf16.mxu0 %v2693_v10 }
 0x326   :  { %v531_v18 = vpack.c.bf16 %v528_v15, %v527_v14  ;;  %536 = vrot.lane.b32.xlu0 %v533_v16, %s2785_s4  ;;  %2471 = vmatpush3.bf16.msra.mxu0 %v2693_v10 }
 0x327   :  { %v518_v19 = vpop.f32.mrb[4].mxu1 }
 0x328   :  { %v519_v20 = vadd.f32 %v518_v19, %v421_v4  ;;  %v520_v21 = vpop.f32.mrb[5].mxu1 }
 0x329   :  { %v2928_v22 = vadd.f32 %v520_v21, %v425_v6  ;;  %v522_v23 = vpop.f32.mrb[6].mxu1 }
 0x32a   :  { %v523_v24 = vadd.f32 %v522_v23, %v421_v4  ;;  %v524_v25 = vpop.f32.mrb[7].mxu1  ;;  %v529_v27 = vmul.f32 0.125, %v519_v20 }
 0x32b   :  { %v2930_v26 = vadd.f32 %v524_v25, %v425_v6 }
 0x32c   :  { %v530_v28 = vmul.f32 0.125, %v523_v24  ;;  %v534_v29 = vpack.c.bf16 %v523_v24, %v519_v20 }
 0x32d   :  { %v683_v30 = vpack.c.bf16 %v2930_v26, %v2928_v22 }
 0x32e   :  { %v532_v31 = vpack.c.bf16 %v530_v28, %v529_v27  ;;  %586 = vrot.lane.b32.xlu1 %v534_v29, %s2785_s4  ;;  %v2694_v27 = vld [vmem:[%s2956_s8 + $0x8] sm:$0xff]   ;;  %v2695_v28 = vld [vmem:[%s2956_s8 + $0x10] sm:$0xff]   ;;  %v2696_v29 = vld [vmem:[%s2956_s8 + $0x18] sm:$0xff]   ;;  %s2250_s4 = sld [smem:[%s3171_s0 + %s2800_s1]]  }
 0x32f   :  { %2472 = vmatprep.subr.bf16.mxu0 %v2694_v27  ;;  %s2251_s8 = sld [smem:[%s3171_s0 + %s2801_s5]]  }
 0x330   :  { %2473 = vmatpush3.bf16.msra.mxu0 %v2694_v27 }
 0x331   :  { %2474 = vmatprep.subr.bf16.mxu0 %v2695_v28 }
 0x334   :  { %2475 = vmatpush3.bf16.msra.mxu0 %v2695_v28 }
 0x335   :  { %2476 = vmatprep.subr.bf16.mxu0 %v2696_v29 }
 0x338   :  { %2477 = vmatpush3.bf16.msra.mxu0 %v2696_v29 }
 0x398   :  { %v537_v32 = vpop.permute.xlu0 %536 }
 0x399   :  { %v542_v33 = vsel %vm275_vm0, %v537_v32, 0 }
 0x39a   :  { %2447 = vmatpush3.bf16.xpose.msra.mxu1 %v542_v33 }
 0x39b   :  { %2452 = vmatprep.subr.bf16.mxu1 %v2783_v3 }
 0x3a0   :  { %v587_v34 = vpop.permute.xlu1 %586 }
 0x3a1   :  { %v592_v35 = vsel %vm275_vm0, %v587_v34, 0  ;;  %2449 = vmatmul.mubr.msk.bf16.vlgmr.msra.gmra.mrb[8].mxu1 %vm275_vm0, %v531_v18 }
 0x3a2   :  { %2453 = vmatpush3.bf16.xpose.msra.mxu1 %v592_v35  ;;  %2454 = vmatprep.mubr.msk.bf16.mxu1 %vm2784_vm1, %v2783_v3 }
 0x3a3   :  { %2458 = vmatprep.subr.bf16.mxu1 %v2783_v3 }
 0x3a9   :  { %2455 = vmatmul.mubr.msk.bf16.vlgmr.msra.gmra.mrb[12].mxu1 %vm275_vm0, %v532_v31 }
 0x3aa   :  { %2459 = vmatpush3.bf16.msra.mxu1 %v682_v17  ;;  %2460 = vmatprep.mubr.msk.bf16.mxu1 %vm2784_vm1, %v2783_v3 }
 0x3ab   :  { %2464 = vmatprep.subr.bf16.mxu1 %v2783_v3 }
 0x474   :  { %v578_v36 = vpop.f32.mrb[8].mxu1 }
 0x475   :  { %v2450_v37 = vpop.f32.mrb[9].mxu1  ;;  %v636_v38 = vsel %vm635_vm2, %v578_v36, -inf }
 0x476   :  { %637 = vmax.xlane.f32.xlu1 %v636_v38  ;;  %v581_v39 = vpop.f32.mrb[10].mxu1  ;;  %v2298_v38 = vld [vmem:[%s2241_s12] ss:$0 sm:$0xff]  ;;  %s2258_s12 = sld [smem:[%s3171_s0 + %s2802_s9]]  }
 0x477   :  { %v2451_v40 = vpop.f32.mrb[11].mxu1  ;;  %v639_v41 = vsel %vm635_vm2, %v581_v39, -inf }
 0x478   :  { %640 = vmax.xlane.f32.xlu0 %v639_v41 }
 0x47c   :  { %v628_v42 = vpop.f32.mrb[12].mxu1 }
 0x47d   :  { %v2456_v43 = vpop.f32.mrb[13].mxu1  ;;  %v642_v45 = vsel %vm635_vm2, %v628_v42, -inf }
 0x47e   :  { %643 = vmax.xlane.f32.xlu0 %v642_v45  ;;  %v631_v46 = vpop.f32.mrb[14].mxu1 }
 0x47f   :  { %v2457_v48 = vpop.f32.mrb[15].mxu1  ;;  %v645_v49 = vsel %vm635_vm2, %v631_v46, -inf }
 0x480   :  { %646 = vmax.xlane.f32.xlu1 %v645_v49 }
 0x503   :  { %v638_v50 = vpop.xlane.xlu1 %637 }
 0x504   :  { %v648_v51 = vsub.f32 %v578_v36, %v638_v50 }
 0x505   :  { %v641_v52 = vpop.xlane.xlu0 %640 }
 0x506   :  { %v652_v53 = vmul.f32 1.442695, %v648_v51  ;;  %v649_v55 = vsub.f32 %v581_v39, %v641_v52 }
 0x508   :  { %2735 = vpow2.f32 %v652_v53  ;;  %v654_v56 = vmul.f32 1.442695, %v649_v55 }
 0x50a   :  { %2737 = vpow2.f32 %v654_v56 }
 0x50b   :  { %v644_v58 = vpop.xlane.xlu0 %643 }
 0x50c   :  { %v650_v59 = vsub.f32 %v628_v42, %v644_v58 }
 0x50d   :  { %v647_v60 = vpop.xlane.xlu1 %646 }
 0x50e   :  { %v656_v61 = vmul.f32 1.442695, %v650_v59  ;;  %v651_v62 = vsub.f32 %v631_v46, %v647_v60 }
 0x510   :  { %2739 = vpow2.f32 %v656_v61  ;;  %v658_v1 = vmul.f32 1.442695, %v651_v62 }
 0x512   :  { %v2736_v2 = vpop.eup %2735  ;;  %2741 = vpow2.f32 %v658_v1 }
 0x513   :  { %v660_v0 = vsel %vm635_vm2, %v2736_v2, 0.0 }
 0x514   :  { %v2738_v4 = vpop.eup %2737  ;;  %661 = vadd.xlane.f32.xlu0 %v660_v0 }
 0x515   :  { %v663_v5 = vsel %vm635_vm2, %v2738_v4, 0.0 }
 0x516   :  { %664 = vadd.xlane.f32.xlu1 %v663_v5 }
 0x51a   :  { %v2740_v6 = vpop.eup %2739 }
 0x51b   :  { %v666_v7 = vsel %vm635_vm2, %v2740_v6, 0.0 }
 0x51c   :  { %v2742_v8 = vpop.eup %2741  ;;  %667 = vadd.xlane.f32.xlu0 %v666_v7 }
 0x51d   :  { %v669_v9 = vsel %vm635_vm2, %v2742_v8, 0.0 }
 0x51e   :  { %670 = vadd.xlane.f32.xlu1 %v669_v9 }
 0x5a1   :  { %v662_v11 = vpop.xlane.xlu0 %661 }
 0x5a2   :  { %2743 = vrcp.f32 %v662_v11 }
 0x5a3   :  { %v665_v12 = vpop.xlane.xlu1 %664 }
 0x5a4   :  { %2745 = vrcp.f32 %v665_v12 }
 0x5a9   :  { %v668_v13 = vpop.xlane.xlu0 %667 }
 0x5aa   :  { %2747 = vrcp.f32 %v668_v13  ;;  %v2697_v13 = vld [vmem:[%s2244_s16] sm:$0xff]  }
 0x5ab   :  { %v671_v14 = vpop.xlane.xlu1 %670 }
 0x5ac   :  { %v2744_v15 = vpop.eup %2743  ;;  %2749 = vrcp.f32 %v671_v14  ;;  %v2698_v14 = vld [vmem:[%s2244_s16 + $0x8] sm:$0xff]  }
 0x5ad   :  { %v676_v17 = vmul.f32 %v2744_v15, %v2736_v2  ;;  %v2699_v15 = vld [vmem:[%s2244_s16 + $0x10] sm:$0xff]  }
 0x5ae   :  { %v2746_v16 = vpop.eup %2745 }
 0x5af   :  { %v677_v18 = vmul.f32 %v2746_v16, %v2738_v4  ;;  %v2700_v16 = vld [vmem:[%s2244_s16 + $0x18] sm:$0xff]   ;;  %s2254_s16 = sld [smem:[%s3171_s0 + %s2803_s13]]  }
 0x5b1   :  { %v680_v19 = vpack.c.bf16 %v677_v18, %v676_v17 }
 0x5b3   :  { %2461 = vmatmul.mubr.msk.bf16.vlgmr.msra.gmra.mrb[16].mxu1 %vm635_vm2, %v680_v19 }
 0x5b4   :  { %v2748_v20 = vpop.eup %2747  ;;  %2465 = vmatpush3.bf16.msra.mxu1 %v683_v30  ;;  %2466 = vmatprep.mubr.msk.bf16.mxu1 %vm2784_vm1, %v2783_v3 }
 0x5b5   :  { %v678_v23 = vmul.f32 %v2748_v20, %v2740_v6  ;;  %2482 = vmatprep.subr.bf16.mxu1 %v2697_v13 }
 0x5b6   :  { %v2750_v21 = vpop.eup %2749 }
 0x5b7   :  { %v679_v24 = vmul.f32 %v2750_v21, %v2742_v8 }
 0x5b9   :  { %v681_v25 = vpack.c.bf16 %v679_v24, %v678_v23 }
 0x5bb   :  { %2467 = vmatmul.mubr.msk.bf16.vlgmr.msra.gmra.mrb[20].mxu1 %vm635_vm2, %v681_v25 }
 0x5bc   :  { %2483 = vmatpush3.bf16.msra.mxu1 %v2697_v13 }
 0x5bd   :  { %2484 = vmatprep.subr.bf16.mxu1 %v2698_v14 }
 0x5c0   :  { %2485 = vmatpush3.bf16.msra.mxu1 %v2698_v14 }
 0x5c1   :  { %2486 = vmatprep.subr.bf16.mxu1 %v2699_v15 }
 0x5c4   :  { %2487 = vmatpush3.bf16.msra.mxu1 %v2699_v15 }
 0x5c5   :  { %2488 = vmatprep.subr.bf16.mxu1 %v2700_v16 }
 0x5c8   :  { %2489 = vmatpush3.bf16.msra.mxu1 %v2700_v16 }
 0x686   :  { %v721_v22 = vpop.f32.mrb[16].mxu1 }
 0x687   :  { %v2462_v26 = vpop.f32.mrb[17].mxu1 }
 0x688   :  { %v724_v30 = vpop.f32.mrb[18].mxu1 }
 0x689   :  { %v772_v31 = vpack.c.bf16 %v724_v30, %v721_v22  ;;  %v2463_v32 = vpop.f32.mrb[19].mxu1  ;;  %v2305_v30 = vld [vmem:[%s2242_s20] ss:$0 sm:$0xff]  ;;  %s2256_s20 = sld [smem:[%s3171_s0 + %s2804_s17]]  }
 0x68b   :  { %2478 = vmatprep.mubr.msk.bf16.mxu0 %vm275_vm0, %v772_v31 }
 0x68e   :  { %v765_v33 = vpop.f32.mrb[20].mxu1 }
 0x68f   :  { %v2468_v34 = vpop.f32.mrb[21].mxu1 }
 0x690   :  { %v768_v35 = vpop.f32.mrb[22].mxu1 }
 0x691   :  { %v773_v36 = vpack.c.bf16 %v768_v35, %v765_v33  ;;  %v2469_v37 = vpop.f32.mrb[23].mxu1 }
 0x693   :  { %2479 = vmatmul.mubr.msk.bf16.vlgmr.msra.gmra.mrb[8].mxu0 %vm275_vm0, %v773_v36  ;;  %v2306_v36 = vld [vmem:[%s2243_s24] ss:$0 sm:$0xff]  ;;  %s2259_s24 = sld [smem:[%s3171_s0 + %s2805_s21]]  }
 0x766   :  { %v2480_v39 = vpop.f32.mrb[8].mxu0 }
 0x767   :  { %v853_v40 = vpop.f32.mrb[9].mxu0  ;;  %v862_v41 = vadd.f32 %v2480_v39, %v2298_v38 }
 0x768   :  { %v854_v42 = vadd.f32 %v2298_v38, %v853_v40  ;;  %v2481_v43 = vpop.f32.mrb[10].mxu0 }
 0x769   :  { %v856_v45 = vpop.f32.mrb[11].mxu0  ;;  %v865_v48 = vadd.f32 %v2481_v43, %v2298_v38  ;;  %v2978_v50 = vadd.f32 %v862_v41, %v2890_v54 }
 0x76a   :  { %v2975_v46 = vadd.f32 %v854_v42, %v2882_v44  ;;  %v857_v49 = vadd.f32 %v2298_v38, %v856_v45 }
 0x76b   :  { %v2986_v53 = vadd.f32 %v865_v48, %v2892_v57  ;;  %v878_v44 = vsel %vm275_vm0, %v2978_v50, 0.0 }
 0x76c   :  { %v2981_v51 = vadd.f32 %v857_v49, %v2884_v47  ;;  %v872_v52 = vsel %vm275_vm0, %v2975_v46, 0.0 }
 0x76d   :  { %873 = vadd.xlane.f32.xlu0 %v872_v52  ;;  %v881_v54 = vsel %vm275_vm0, %v2986_v53, 0.0 }
 0x76e   :  { %v875_v55 = vsel %vm275_vm0, %v2981_v51, 0.0 }
 0x76f   :  { %876 = vadd.xlane.f32.xlu1 %v875_v55 }
 0x771   :  { %879 = vadd.xlane.f32.xlu0 %v878_v44  ;;  %v2701_v44 = vld [vmem:[%s2246_s28] sm:$0xff]  }
 0x772   :  { %2494 = vmatprep.subr.bf16.mxu0 %v2701_v44 }
 0x773   :  { %882 = vadd.xlane.f32.xlu1 %v881_v54  ;;  %2495 = vmatpush3.bf16.msra.mxu0 %v2701_v44  ;;  %v2702_v54 = vld [vmem:[%s2246_s28 + $0x8] sm:$0xff]   ;;  %v2712_v44 = vld [vmem:[%s3019_s2 + $0x18] sm:$0xff]  }
 0x774   :  { %2496 = vmatprep.subr.bf16.mxu0 %v2702_v54 }
 0x777   :  { %2497 = vmatpush3.bf16.msra.mxu0 %v2702_v54  ;;  %v2314_v54 = vld [vmem:[%s2247_s14] ss:$0 sm:$0xff]  ;;  %s2262_s14 = sld [smem:[%s3171_s0 + %s2811_s11]]  }
 0x7fa   :  { %v874_v47 = vpop.xlane.xlu0 %873 }
 0x7fb   :  { %v884_v56 = vmul.f32 0.015625, %v874_v47  ;;  %v2703_v47 = vld [vmem:[%s2246_s28 + $0x10] sm:$0xff]  }
 0x7fc   :  { %v877_v58 = vpop.xlane.xlu1 %876  ;;  %2498 = vmatprep.subr.bf16.mxu0 %v2703_v47 }
 0x7fd   :  { %v888_v59 = vsub.f32 %v2975_v46, %v884_v56  ;;  %v885_v60 = vmul.f32 0.015625, %v877_v58  ;;  %2499 = vmatpush3.bf16.msra.mxu0 %v2703_v47  ;;  %v2704_v56 = vld [vmem:[%s2246_s28 + $0x18] sm:$0xff]   ;;  %v2705_v58 = vld [vmem:[%s2246_s28 + $0x20] sm:$0xff]  }
 0x7fe   :  { %v880_v57 = vpop.xlane.xlu0 %879  ;;  %2500 = vmatprep.subr.bf16.mxu0 %v2704_v56 }
 0x7ff   :  { %v889_v61 = vsub.f32 %v2981_v51, %v885_v60  ;;  %v886_v62 = vmul.f32 0.015625, %v880_v57  ;;  %v892_v1 = vmul.f32 %v888_v59, %v888_v59  ;;  %v2707_v60 = vld [vmem:[%s2246_s28 + $0x30] sm:$0xff]   ;;  %v2708_v57 = vld [vmem:[%s2246_s28 + $0x38] sm:$0xff]  }
 0x800   :  { %v883_v2 = vpop.xlane.xlu1 %882 }
 0x801   :  { %v890_v0 = vsub.f32 %v2978_v50, %v886_v62  ;;  %v887_v4 = vmul.f32 0.015625, %v883_v2  ;;  %v896_v5 = vsel %vm275_vm0, %v892_v1, 0.0  ;;  %v893_v6 = vmul.f32 %v889_v61, %v889_v61  ;;  %2501 = vmatpush3.bf16.msra.mxu0 %v2704_v56  ;;  %v2710_v62 = vld [vmem:[%s3019_s2 + $0x8] sm:$0xff]   ;;  %v2307_v1 = vld [vmem:[%s2245_s6] ss:$0 sm:$0xff]  ;;  %s2260_s6 = sld [smem:[%s3171_s0 + %s2808_s3]]  }
 0x802   :  { %897 = vadd.xlane.f32.xlu0 %v896_v5  ;;  %2502 = vmatprep.subr.bf16.mxu0 %v2705_v58 }
 0x803   :  { %v891_v7 = vsub.f32 %v2986_v53, %v887_v4  ;;  %v899_v8 = vsel %vm275_vm0, %v893_v6, 0.0  ;;  %v894_v9 = vmul.f32 %v890_v0, %v890_v0 }
 0x804   :  { %900 = vadd.xlane.f32.xlu1 %v899_v8 }
 0x805   :  { %v902_v10 = vsel %vm275_vm0, %v894_v9, 0.0  ;;  %v895_v11 = vmul.f32 %v891_v7, %v891_v7  ;;  %2503 = vmatpush3.bf16.msra.mxu0 %v2705_v58 }
 0x806   :  { %903 = vadd.xlane.f32.xlu0 %v902_v10 }
 0x807   :  { %v905_v12 = vsel %vm275_vm0, %v895_v11, 0.0 }
 0x808   :  { %906 = vadd.xlane.f32.xlu1 %v905_v12 }
 0x88f   :  { %v898_v17 = vpop.xlane.xlu0 %897 }
 0x890   :  { %v908_v18 = vmul.f32 0.015625, %v898_v17 }
 0x891   :  { %v901_v19 = vpop.xlane.xlu1 %900 }
 0x892   :  { %v912_v20 = vadd.f32 1e-05, %v908_v18  ;;  %v909_v21 = vmul.f32 0.015625, %v901_v19 }
 0x893   :  { %v904_v23 = vpop.xlane.xlu0 %903 }
 0x894   :  { %2751 = vrsqrt.f32 %v912_v20  ;;  %v913_v24 = vadd.f32 1e-05, %v909_v21  ;;  %v910_v25 = vmul.f32 0.015625, %v904_v23 }
 0x895   :  { %v907_v27 = vpop.xlane.xlu1 %906 }
 0x896   :  { %2753 = vrsqrt.f32 %v913_v24  ;;  %v914_v28 = vadd.f32 1e-05, %v910_v25  ;;  %v911_v29 = vmul.f32 0.015625, %v907_v27 }
 0x898   :  { %2755 = vrsqrt.f32 %v914_v28  ;;  %v915_v22 = vadd.f32 1e-05, %v911_v29 }
 0x89a   :  { %2757 = vrsqrt.f32 %v915_v22 }
 0x89e   :  { %v2752_v26 = vpop.eup %2751 }
 0x89f   :  { %v920_v31 = vmul.f32 %v2752_v26, %v888_v59  ;;  %v2706_v59 = vld [vmem:[%s2246_s28 + $0x28] sm:$0xff]   ;;  %s2261_s28 = sld [smem:[%s3171_s0 + %s2806_s25]]  }
 0x8a0   :  { %v2754_v32 = vpop.eup %2753  ;;  %2504 = vmatprep.subr.bf16.mxu0 %v2706_v59 }
 0x8a1   :  { %v921_v33 = vmul.f32 %v2754_v32, %v889_v61  ;;  %v931_v34 = vmul.f32 %v2305_v30, %v920_v31  ;;  %2505 = vmatpush3.bf16.msra.mxu0 %v2706_v59  ;;  %v2709_v61 = vld [vmem:[%s3019_s2] sm:$0xff]  }
 0x8a2   :  { %v2756_v35 = vpop.eup %2755  ;;  %2506 = vmatprep.subr.bf16.mxu0 %v2707_v60  ;;  %2514 = vmatprep.subr.bf16.mxu1 %v2709_v61 }
 0x8a3   :  { %v922_v37 = vmul.f32 %v2756_v35, %v890_v0  ;;  %v932_v38 = vmul.f32 %v2305_v30, %v921_v33  ;;  %v942_v42 = vadd.f32 %v2306_v36, %v931_v34 }
 0x8a4   :  { %v2758_v39 = vpop.eup %2757 }
 0x8a5   :  { %v933_v40 = vmul.f32 %v2305_v30, %v922_v37  ;;  %v923_v41 = vmul.f32 %v2758_v39, %v891_v7  ;;  %v943_v43 = vadd.f32 %v2306_v36, %v932_v38  ;;  %2507 = vmatpush3.bf16.msra.mxu0 %v2707_v60 }
 0x8a6   :  { %2508 = vmatprep.subr.bf16.mxu0 %v2708_v57 }
 0x8a7   :  { %v934_v45 = vmul.f32 %v2305_v30, %v923_v41  ;;  %v946_v48 = vpack.c.bf16 %v943_v43, %v942_v42  ;;  %v944_v49 = vadd.f32 %v2306_v36, %v933_v40 }
 0x8a9   :  { %2490 = vmatprep.mubr.msk.bf16.mxu1 %vm275_vm0, %v946_v48  ;;  %v945_v52 = vadd.f32 %v2306_v36, %v934_v45  ;;  %2509 = vmatpush3.bf16.msra.mxu0 %v2708_v57 }
 0x8ab   :  { %v947_v55 = vpack.c.bf16 %v945_v52, %v944_v49 }
 0x8ad   :  { %2491 = vmatmul.mubr.msk.bf16.vlgmr.msra.gmra.mrb[24].mxu1 %vm275_vm0, %v947_v55  ;;  %v2711_v55 = vld [vmem:[%s3019_s2 + $0x10] sm:$0xff]   ;;  %s2265_s2 = sld [smem:[%s3171_s0 + %s2807_s29]]  }
 0x8ae   :  { %2515 = vmatpush3.bf16.msra.mxu1 %v2709_v61 }
 0x8af   :  { %2516 = vmatprep.subr.bf16.mxu1 %v2710_v62 }
 0x8b2   :  { %2517 = vmatpush3.bf16.msra.mxu1 %v2710_v62 }
 0x8b3   :  { %2518 = vmatprep.subr.bf16.mxu1 %v2711_v55 }
 0x8b6   :  { %2519 = vmatpush3.bf16.msra.mxu1 %v2711_v55 }
 0x8b7   :  { %2520 = vmatprep.subr.bf16.mxu1 %v2712_v44 }
 0x8ba   :  { %2521 = vmatpush3.bf16.msra.mxu1 %v2712_v44 }
 0x8bb   :  { %2526 = vmatprep.subr.bf16.mxu1 %v2783_v3 }
 0x980   :  { %v2492_v2 = vpop.f32.mrb[24].mxu1 }
 0x981   :  { %v1036_v0 = vadd.f32 %v2492_v2, %v2307_v1  ;;  %v1027_v4 = vpop.f32.mrb[25].mxu1 }
 0x982   :  { %v1028_v5 = vadd.f32 %v2307_v1, %v1027_v4  ;;  %v2493_v6 = vpop.f32.mrb[26].mxu1 }
 0x983   :  { %v1044_v7 = vmul.f32 %v1036_v0, %v1036_v0  ;;  %v1039_v8 = vadd.f32 %v2493_v6, %v2307_v1  ;;  %v1030_v9 = vpop.f32.mrb[27].mxu1 }
 0x984   :  { %v1042_v10 = vmul.f32 %v1028_v5, %v1028_v5  ;;  %v1031_v11 = vadd.f32 %v2307_v1, %v1030_v9  ;;  %v2716_v9 = vld [vmem:[%s2255_s26] sm:$0xff]  }
 0x985   :  { %v1048_v12 = vmul.f32 %v1044_v7, %v1036_v0  ;;  %v1045_v13 = vmul.f32 %v1039_v8, %v1039_v8  ;;  %v2713_v7 = vld [vmem:[%s3032_s10] sm:$0xff]   ;;  %2534 = vmatprep.subr.bf16.mxu0 %v2716_v9 }
 0x986   :  { %v1046_v14 = vmul.f32 %v1042_v10, %v1028_v5  ;;  %v1043_v15 = vmul.f32 %v1031_v11, %v1031_v11  ;;  %v2717_v10 = vld [vmem:[%s2257_s22 + $0x8] sm:$0xff]  }
 0x987   :  { %v1052_v16 = vmul.f32 0.044715, %v1048_v12  ;;  %v1049_v17 = vmul.f32 %v1045_v13, %v1039_v8  ;;  %v2323_v12 = vld [vmem:[%s2249_s30] ss:$0 sm:$0xff] }
 0x988   :  { %v1050_v18 = vmul.f32 0.044715, %v1046_v14  ;;  %v1047_v19 = vmul.f32 %v1043_v15, %v1031_v11  ;;  %v2330_v14 = vld [vmem:[%s2250_s4] ss:$0 sm:$0xff] }
 0x989   :  { %v1056_v20 = vadd.f32 %v1052_v16, %v1036_v0  ;;  %v1053_v21 = vmul.f32 0.044715, %v1049_v17 }
 0x98a   :  { %v1054_v23 = vadd.f32 %v1050_v18, %v1028_v5  ;;  %v1051_v24 = vmul.f32 0.044715, %v1047_v19 }
 0x98b   :  { %v1060_v25 = vmul.f32 0.7978846, %v1056_v20  ;;  %v1057_v27 = vadd.f32 %v1053_v21, %v1039_v8 }
 0x98c   :  { %v1058_v28 = vmul.f32 0.7978846, %v1054_v23  ;;  %v1055_v29 = vadd.f32 %v1051_v24, %v1031_v11  ;;  %v1313_v23 = vld [vmem:[%s2251_s8 + $0x10] sm:$0xff] }
 0x98d   :  { %2759 = vtanh.f32 %v1060_v25  ;;  %v1061_v22 = vmul.f32 0.7978846, %v1057_v27  ;;  %v1314_v25 = vld [vmem:[%s2251_s8 + $0x18] sm:$0xff] }
 0x98e   :  { %2761 = vtanh.f32 %v1058_v28  ;;  %v1059_v26 = vmul.f32 0.7978846, %v1055_v29  ;;  %v1311_v28 = vld [vmem:[%s2251_s8] sm:$0xff] }
 0x98f   :  { %2763 = vtanh.f32 %v1061_v22  ;;  %v1312_v22 = vld [vmem:[%s2251_s8 + $0x8] sm:$0xff] }
 0x990   :  { %2765 = vtanh.f32 %v1059_v26 }
 0x997   :  { %v2760_v30 = vpop.eup %2759 }
 0x998   :  { %v2762_v31 = vpop.eup %2761  ;;  %v1068_v32 = vadd.f32 1.0, %v2760_v30 }
 0x999   :  { %v2764_v33 = vpop.eup %2763  ;;  %v1066_v34 = vadd.f32 1.0, %v2762_v31 }
 0x99a   :  { %v2766_v35 = vpop.eup %2765  ;;  %v1072_v36 = vmul.f32 0.5, %v1068_v32  ;;  %v1069_v37 = vadd.f32 1.0, %v2764_v33 }
 0x99b   :  { %v1067_v38 = vadd.f32 1.0, %v2766_v35  ;;  %v1070_v39 = vmul.f32 0.5, %v1066_v34 }
 0x99c   :  { %v1073_v40 = vmul.f32 0.5, %v1069_v37  ;;  %v1076_v42 = vmul.f32 %v1072_v36, %v1036_v0 }
 0x99d   :  { %v1071_v41 = vmul.f32 0.5, %v1067_v38  ;;  %v1074_v45 = vmul.f32 %v1070_v39, %v1028_v5 }
 0x99e   :  { %v1077_v43 = vmul.f32 %v1073_v40, %v1039_v8  ;;  %v2715_v8 = vld [vmem:[%s2257_s22] sm:$0xff]   ;;  %s2264_s22 = sld [smem:[%s3171_s0 + %s2813_s19]]  }
 0x99f   :  { %v1075_v48 = vmul.f32 %v1071_v41, %v1031_v11  ;;  %v2718_v11 = vld [vmem:[%s2255_s26 + $0x8] sm:$0xff]   ;;  %s2267_s26 = sld [smem:[%s3171_s0 + %s2815_s23]]  }
 0x9a0   :  { %v1079_v49 = vpack.c.bf16 %v1077_v43, %v1076_v42  ;;  %v2340_v43 = vld [vmem:[%s2258_s12] ss:$0 sm:$0xff] }
 0x9a1   :  { %v1078_v52 = vpack.c.bf16 %v1075_v48, %v1074_v45  ;;  %v2331_v48 = vld [vmem:[%s2254_s16] ss:$0 sm:$0xff] }
 0x9a3   :  { %2510 = vmatprep.mubr.bf16.mxu0 %v1078_v52  ;;  %v2335_v52 = vld [vmem:[%s2256_s20] ss:$0 sm:$0xff] }
 0x9a4   :  { %2511 = vmatmul.mubr.bf16.vlgmr.msra.gmra.mrb[12].mxu0 %v1079_v49 }
 0x9a5   :  { %2535 = vmatpush3.bf16.msra.mxu0 %v2716_v9 }
 0x9a6   :  { %2536 = vmatprep.subr.bf16.mxu0 %v2718_v11 }
 0x9a9   :  { %2537 = vmatpush3.bf16.msra.mxu0 %v2718_v11 }
 0x9aa   :  { %2550 = vmatprep.subr.bf16.mxu0 %v2783_v3 }
 0xa77   :  { %v2512_v47 = vpop.f32.mrb[12].mxu0 }
 0xa78   :  { %v1194_v56 = vadd.f32 %v2512_v47, %v2314_v54  ;;  %v1185_v58 = vpop.f32.mrb[13].mxu0 }
 0xa79   :  { %v1186_v59 = vadd.f32 %v2314_v54, %v1185_v58  ;;  %v2513_v60 = vpop.f32.mrb[14].mxu0 }
 0xa7a   :  { %v1197_v57 = vadd.f32 %v2513_v60, %v2314_v54  ;;  %v1188_v61 = vpop.f32.mrb[15].mxu0  ;;  %v1202_v1 = vadd.f32 %v1194_v56, %v2978_v50  ;;  %v3057_v50 = vld [vmem:[%s2252_s18] sm:$0xff] }
 0xa7b   :  { %v1189_v62 = vadd.f32 %v2314_v54, %v1188_v61  ;;  %v1200_v0 = vadd.f32 %v1186_v59, %v2975_v46  ;;  %v2714_v46 = vld [vmem:[%s3032_s10 + $0x8] sm:$0xff]   ;;  %s2263_s10 = sld [smem:[%s3171_s0 + %s2809_s7]]  }
 0xa7c   :  { %v1203_v2 = vadd.f32 %v1197_v57, %v2986_v53 }
 0xa7d   :  { %v1201_v4 = vadd.f32 %v1189_v62, %v2981_v51  ;;  %v3059_v51 = vld [vmem:[%s2252_s18 + $0x8] sm:$0xff]  ;;  %s2266_s18 = sld [smem:[%s3171_s0 + %s2812_s15]]  }
 0xa7e   :  { %v1205_v5 = vpack.c.bf16 %v1203_v2, %v1202_v1  ;;  %v1321_v53 = vpack.c.bf16 %v3059_v51, %v3057_v50 }
 0xa7f   :  { %v1204_v6 = vpack.c.bf16 %v1201_v4, %v1200_v0 }
 0xa81   :  { %2522 = vmatprep.mubr.msk.bf16.mxu1 %vm275_vm0, %v1204_v6 }
 0xa82   :  { %2523 = vmatmul.mubr.msk.bf16.vlgmr.msra.gmra.mrb[28].mxu1 %vm275_vm0, %v1205_v5 }
 0xa83   :  { %2527 = vmatpush3.bf16.msra.mxu1 %v2713_v7  ;;  %2530 = vmatprep.mubr.msk.bf16.mxu1 %vm2784_vm1, %v2783_v3 }
 0xa84   :  { %2528 = vmatprep.subr.bf16.mxu1 %v2783_v3 }
 0xa87   :  { %2529 = vmatpush3.bf16.msra.mxu1 %v2714_v46 }
 0xa88   :  { %2542 = vmatprep.subr.bf16.mxu1 %v2715_v8 }
 0xa8a   :  { %2531 = vmatmul.mubr.msk.bf16.vlgmr.msra.gmra.mrb[32].mxu1 %vm1345_vm3, %v1321_v53 }
 0xa8b   :  { %2543 = vmatpush3.bf16.msra.mxu1 %v2715_v8 }
 0xa8c   :  { %2544 = vmatprep.subr.bf16.mxu1 %v2717_v10 }
 0xa8f   :  { %2545 = vmatpush3.bf16.msra.mxu1 %v2717_v10 }
 0xa90   :  { %2556 = vmatprep.subr.bf16.mxu1 %v2783_v3 }
 0xb55   :  { %v2524_v13 = vpop.f32.mrb[28].mxu1 }
 0xb56   :  { %v1294_v15 = vadd.f32 %v2524_v13, %v2323_v12  ;;  %v1285_v16 = vpop.f32.mrb[29].mxu1 }
 0xb57   :  { %v1286_v17 = vadd.f32 %v2323_v12, %v1285_v16  ;;  %v2525_v18 = vpop.f32.mrb[30].mxu1 }
 0xb58   :  { %v1309_v19 = vadd.f32 %v2330_v14, %v1294_v15  ;;  %v1297_v20 = vadd.f32 %v2525_v18, %v2323_v12  ;;  %v1288_v21 = vpop.f32.mrb[31].mxu1 }
 0xb59   :  { %v1307_v24 = vadd.f32 %v2330_v14, %v1286_v17  ;;  %v1289_v27 = vadd.f32 %v2323_v12, %v1288_v21 }
 0xb5a   :  { %v1310_v29 = vadd.f32 %v2330_v14, %v1297_v20  ;;  %v1317_v30 = vadd.f32 %v1313_v23, %v1309_v19 }
 0xb5b   :  { %v1308_v26 = vadd.f32 %v2330_v14, %v1289_v27  ;;  %v1315_v33 = vadd.f32 %v1311_v28, %v1307_v24 }
 0xb5c   :  { %v1318_v31 = vadd.f32 %v1314_v25, %v1310_v29  ;;  %v3075_v32 = vpack.c.bf16 %v1310_v29, %v1309_v19 }
 0xb5d   :  { %v1316_v34 = vadd.f32 %v1312_v22, %v1308_v26  ;;  %v3077_v35 = vpack.c.bf16 %v1308_v26, %v1307_v24  ;;  %v1383_v38 = vpop.f32.mrb[32].mxu1 }
 0xb5e   :  { %v1391_v36 = vpack.c.bf16 %v1318_v31, %v1317_v30  ;;  %v2532_v39 = vpop.f32.mrb[33].mxu1  ;;  %v1384_v7 = vadd.f32 %v2331_v48, %v1383_v38 }
 0xb5f   :  { %v1390_v37 = vpack.c.bf16 %v1316_v34, %v1315_v33  ;;  %2546 = vmatprep.mubr.msk.bf16.mxu1 %vm1345_vm3, %v3077_v35  ;;  %v1386_v40 = vpop.f32.mrb[34].mxu1 }
 0xb60   :  { %2547 = vmatmul.mubr.msk.bf16.vlgmr.msra.gmra.mrb[36].mxu1 %vm1345_vm3, %v3075_v32  ;;  %v2533_v41 = vpop.f32.mrb[35].mxu1  ;;  %v1387_v57 = vadd.f32 %v2331_v48, %v1386_v40  ;;  %v1550_v10 = vmul.f32 0.17677669, %v1384_v7 }
 0xb61   :  { %2538 = vmatprep.mubr.msk.bf16.mxu0 %vm1345_vm3, %v1390_v37  ;;  %2558 = vmatprep.mubr.msk.bf16.mxu1 %vm2784_vm1, %v2783_v3 }
 0xb62   :  { %2539 = vmatmul.mubr.msk.bf16.vlgmr.msra.gmra.mrb[16].mxu0 %vm1345_vm3, %v1391_v36  ;;  %v1551_v53 = vmul.f32 0.17677669, %v1387_v57  ;;  %v1552_v12 = vpack.c.bf16 %v1550_v10, %v1550_v10  ;;  %v2723_v57 = vld [vmem:[%s2265_s2] sm:$0xff]  }
 0xb63   :  { %2552 = vmatprep.mubr.msk.bf16.mxu0 %vm2784_vm1, %v2783_v3 }
 0xb64   :  { %v1553_v11 = vpack.c.bf16 %v1551_v53, %v1551_v53 }
 0xc33   :  { %v2548_v42 = vpop.f32.mrb[36].mxu1 }
 0xc34   :  { %v1535_v45 = vpop.f32.mrb[37].mxu1  ;;  %v1544_v44 = vadd.f32 %v2548_v42, %v2340_v43  ;;  %v2719_v42 = vld [vmem:[%s2259_s24] sm:$0xff]  }
 0xc35   :  { %v2540_v49 = vpop.f32.mrb[16].mxu0  ;;  %v2549_v55 = vpop.f32.mrb[38].mxu1  ;;  %v1536_v58 = vadd.f32 %v2340_v43, %v1535_v45  ;;  %v2720_v45 = vld [vmem:[%s2259_s24 + $0x8] sm:$0xff]  }
 0xc36   :  { %v1547_v54 = vadd.f32 %v2549_v55, %v2340_v43  ;;  %v1455_v47 = vpop.f32.mrb[17].mxu0  ;;  %v1538_v56 = vpop.f32.mrb[39].mxu1  ;;  %v1464_v61 = vadd.f32 %v2540_v49, %v2335_v52 }
 0xc37   :  { %v1539_v59 = vadd.f32 %v2340_v43, %v1538_v56  ;;  %v2541_v60 = vpop.f32.mrb[18].mxu0  ;;  %v1456_v0 = vadd.f32 %v2335_v52, %v1455_v47 }
 0xc38   :  { %v1673_v62 = vpack.c.bf16 %v1547_v54, %v1544_v44  ;;  %v1467_v1 = vadd.f32 %v2541_v60, %v2335_v52  ;;  %v1458_v2 = vpop.f32.mrb[19].mxu0  ;;  %v2722_v60 = vld [vmem:[%s2261_s28 + $0x8] sm:$0xff]  }
 0xc39   :  { %v1672_v4 = vpack.c.bf16 %v1539_v59, %v1536_v58  ;;  %v1459_v5 = vadd.f32 %v2335_v52, %v1458_v2  ;;  %v2721_v59 = vld [vmem:[%s2261_s28] sm:$0xff]  }
 0xc3a   :  { %v1555_v6 = vpack.c.bf16 %v1467_v1, %v1464_v61  ;;  %v2349_v61 = vld [vmem:[%s2260_s6] ss:$0 sm:$0xff] }
 0xc3b   :  { %v1554_v46 = vpack.c.bf16 %v1459_v5, %v1456_v0 }
 0xc3c   :  { %v1606_v8 = vsel %vm1345_vm3, %v1555_v6, 0 }
 0xc3d   :  { %2557 = vmatpush3.bf16.xpose.msra.mxu1 %v1606_v8  ;;  %v1560_v9 = vsel %vm1345_vm3, %v1554_v46, 0 }
 0xc3e   :  { %2551 = vmatpush3.bf16.xpose.msra.mxu0 %v1560_v9  ;;  %2568 = vmatprep.subr.bf16.mxu1 %v2783_v3 }
 0xc3f   :  { %2562 = vmatprep.subr.bf16.mxu0 %v2783_v3 }
 0xc44   :  { %2559 = vmatmul.mubr.msk.bf16.vlgmr.msra.gmra.mrb[40].mxu1 %vm1345_vm3, %v1553_v11 }
 0xc45   :  { %2553 = vmatmul.mubr.msk.bf16.vlgmr.msra.gmra.mrb[20].mxu0 %vm1345_vm3, %v1552_v12  ;;  %2569 = vmatpush3.bf16.msra.mxu1 %v1673_v62 }
 0xc46   :  { %2563 = vmatpush3.bf16.msra.mxu0 %v1672_v4  ;;  %2570 = vmatprep.mubr.msk.bf16.mxu1 %vm2784_vm1, %v2783_v3 }
 0xc47   :  { %2564 = vmatprep.mubr.msk.bf16.mxu0 %vm2784_vm1, %v2783_v3  ;;  %2574 = vmatprep.subr.bf16.mxu0 %v2783_v3 }
 0xc48   :  { %2582 = vmatprep.subr.bf16.mxu1 %v2783_v3 }
 0xd17   :  { %v1642_v13 = vpop.f32.mrb[40].mxu1 }
 0xd18   :  { %v1596_v14 = vpop.f32.mrb[20].mxu0  ;;  %v1651_v15 = vsel %vm635_vm2, %v1642_v13, -inf  ;;  %v2560_v16 = vpop.f32.mrb[41].mxu1 }
 0xd19   :  { %1652 = vmax.xlane.f32.xlu1 %v1651_v15  ;;  %v1648_v17 = vsel %vm635_vm2, %v1596_v14, -inf  ;;  %v2554_v18 = vpop.f32.mrb[21].mxu0  ;;  %v1645_v19 = vpop.f32.mrb[42].mxu1 }
 0xd1a   :  { %1649 = vmax.xlane.f32.xlu0 %v1648_v17  ;;  %v1599_v20 = vpop.f32.mrb[22].mxu0  ;;  %v2561_v21 = vpop.f32.mrb[43].mxu1 }
 0xd1b   :  { %v2555_v23 = vpop.f32.mrb[23].mxu0 }
 0xd1c   :  { %v2361_v23 = vld [vmem:[%s2266_s18] ss:$0 sm:$0xff] }
 0xda6   :  { %v1653_v24 = vpop.xlane.xlu1 %1652 }
 0xda7   :  { %v1655_v25 = vsub.f32 %v1642_v13, %v1653_v24  ;;  %v1650_v27 = vpop.xlane.xlu0 %1649  ;;  %v2724_v13 = vld [vmem:[%s2265_s2 + $0x8] sm:$0xff]  }
 0xda8   :  { %v1654_v28 = vsub.f32 %v1596_v14, %v1650_v27 }
 0xda9   :  { %v1658_v29 = vmul.f32 1.442695, %v1655_v25 }
 0xdaa   :  { %v1656_v22 = vmul.f32 1.442695, %v1654_v28 }
 0xdab   :  { %2767 = vpow2.f32 %v1658_v29 }
 0xdac   :  { %2769 = vpow2.f32 %v1656_v22 }
 0xdb5   :  { %v2768_v26 = vpop.eup %2767 }
 0xdb6   :  { %v2770_v30 = vpop.eup %2769  ;;  %v1663_v31 = vsel %vm635_vm2, %v2768_v26, 0.0 }
 0xdb7   :  { %1664 = vadd.xlane.f32.xlu1 %v1663_v31  ;;  %v1660_v33 = vsel %vm635_vm2, %v2770_v30, 0.0 }
 0xdb8   :  { %1661 = vadd.xlane.f32.xlu0 %v1660_v33 }
 0xe44   :  { %v1665_v34 = vpop.xlane.xlu1 %1664 }
 0xe45   :  { %2771 = vrcp.f32 %v1665_v34  ;;  %v1662_v36 = vpop.xlane.xlu0 %1661 }
 0xe46   :  { %2773 = vrcp.f32 %v1662_v36  ;;  %v2357_v36 = vld [vmem:[%s2264_s22] ss:$0 sm:$0xff] }
 0xe4f   :  { %v2772_v37 = vpop.eup %2771 }
 0xe50   :  { %v2774_v38 = vpop.eup %2773  ;;  %v1669_v39 = vmul.f32 %v2772_v37, %v2768_v26 }
 0xe51   :  { %v1668_v40 = vmul.f32 %v2774_v38, %v2770_v30 }
 0xe52   :  { %v1671_v41 = vpack.c.bf16 %v1669_v39, %v1669_v39 }
 0xe53   :  { %v1670_v43 = vpack.c.bf16 %v1668_v40, %v1668_v40 }
 0xe54   :  { %2571 = vmatmul.mubr.msk.bf16.vlgmr.msra.gmra.mrb[44].mxu1 %vm635_vm2, %v1671_v41 }
 0xe55   :  { %2565 = vmatmul.mubr.msk.bf16.vlgmr.msra.gmra.mrb[24].mxu0 %vm635_vm2, %v1670_v43  ;;  %2586 = vmatprep.mubr.msk.bf16.mxu1 %vm2784_vm1, %v2783_v3 }
 0xe56   :  { %2575 = vmatpush3.bf16.msra.mxu0 %v2719_v42  ;;  %2578 = vmatprep.mubr.msk.bf16.mxu0 %vm2784_vm1, %v2783_v3 }
 0xe57   :  { %2576 = vmatprep.subr.bf16.mxu0 %v2783_v3  ;;  %2583 = vmatpush3.bf16.msra.mxu1 %v2721_v59 }
 0xe58   :  { %2584 = vmatprep.subr.bf16.mxu1 %v2783_v3 }
 0xe5a   :  { %2577 = vmatpush3.bf16.msra.mxu0 %v2720_v45 }
 0xe5b   :  { %2590 = vmatprep.subr.bf16.mxu0 %v2783_v3  ;;  %2585 = vmatpush3.bf16.msra.mxu1 %v2722_v60 }
 0xe5c   :  { %2598 = vmatprep.subr.bf16.mxu1 %v2723_v57 }
 0xf27   :  { %v1754_v48 = vpop.f32.mrb[44].mxu1 }
 0xf28   :  { %v1711_v49 = vpop.f32.mrb[24].mxu0  ;;  %v2572_v52 = vpop.f32.mrb[45].mxu1 }
 0xf29   :  { %v1760_v55 = vpack.c.bf16 %v1754_v48, %v1711_v49  ;;  %v2566_v44 = vpop.f32.mrb[25].mxu0  ;;  %v1757_v54 = vpop.f32.mrb[46].mxu1 }
 0xf2a   :  { %v1714_v47 = vpop.f32.mrb[26].mxu0  ;;  %v2573_v56 = vpop.f32.mrb[47].mxu1 }
 0xf2b   :  { %v2567_v58 = vpop.f32.mrb[27].mxu0  ;;  %2579 = vmatmul.mubr.msk.bf16.vlgmr.msra.gmra.mrb[28].mxu0 %vm1345_vm3, %v1760_v55 }
 0xf2c   :  { %2594 = vmatprep.mubr.msk.bf16.mxu0 %vm2784_vm1, %v2783_v3 }
 0xffe   :  { %v1821_v62 = vpop.f32.mrb[28].mxu0 }
 0xfff   :  { %v1822_v1 = vadd.f32 %v2349_v61, %v1821_v62  ;;  %v2580_v2 = vpop.f32.mrb[29].mxu0 }
0x1000   :  { %v1824_v0 = vpop.f32.mrb[30].mxu0 }
0x1001   :  { %v1828_v4 = vadd.f32 %v1822_v1, %v3057_v50  ;;  %v1825_v5 = vadd.f32 %v2349_v61, %v1824_v0  ;;  %v2581_v6 = vpop.f32.mrb[31].mxu0  ;;  %v2725_v50 = vld [vmem:[%s2263_s10] sm:$0xff]  }
0x1002   :  { %2591 = vmatpush3.bf16.msra.mxu0 %v2725_v50 }
0x1003   :  { %v1830_v7 = vpack.c.bf16 %v1828_v4, %v1828_v4  ;;  %v1829_v46 = vadd.f32 %v1825_v5, %v3059_v51  ;;  %2592 = vmatprep.subr.bf16.mxu0 %v2783_v3  ;;  %v2726_v51 = vld [vmem:[%s2263_s10 + $0x8] sm:$0xff]  }
0x1005   :  { %v1845_v53 = vunpack.c.l.b16 %v1830_v7  ;;  %v1831_v8 = vpack.c.bf16 %v1829_v46, %v1829_v46 }
0x1006   :  { %2593 = vmatpush3.bf16.msra.mxu0 %v2726_v51 }
0x1007   :  { %v1847_v9 = vrot.slane %v1845_v53, 1  ;;  %v1846_v10 = vunpack.c.l.b16 %v1831_v8 }
0x1009   :  { %v1849_v11 = vsel %vm1848_vm4, %v1846_v10, %v1847_v9 }
0x100a   :  { %v1850_v12 = vpack.c.b16 %v1849_v11, %v1849_v11 }
0x100c   :  { %2587 = vmatmul.mubr.msk.bf16.vlgmr.msra.gmra.mrb[48].mxu1 %vm1345_vm3, %v1850_v12 }
0x100d   :  { %2599 = vmatpush3.bf16.msra.mxu1 %v2723_v57  ;;  %2602 = vmatprep.mubr.msk.bf16.mxu1 %vm1345_vm3, %v3077_v35  ;;  %v2810_v35 = vmov 0.0|0.0  }
0x100e   :  { %2600 = vmatprep.subr.bf16.mxu1 %v2724_v13  ;;  %2620 = vmatprep.subr.bf16.mxu0 %v2810_v35 }
0x1011   :  { %2601 = vmatpush3.bf16.msra.mxu1 %v2724_v13 }
0x1012   :  { %2624 = vmatprep.subr.bf16.mxu1 %v2810_v35 }
0x1014   :  { %2603 = vmatmul.mubr.msk.bf16.vlgmr.msra.gmra.mrb[52].mxu1 %vm1345_vm3, %v3075_v32  ;;  %v2353_v32 = vld [vmem:[%s2262_s14] ss:$0 sm:$0xff] }
0x1015   :  { %2617 = vmatprep.mubr.msk.f32.mxu1 %vm2784_vm1, %v2783_v3 }
0x10df   :  { %v1900_v14 = vpop.f32.mrb[48].mxu1 }
0x10e0   :  { %v1901_v15 = vadd.f32 %v2353_v32, %v1900_v14  ;;  %v2588_v16 = vpop.f32.mrb[49].mxu1 }
0x10e1   :  { %v1903_v17 = vpop.f32.mrb[50].mxu1 }
0x10e2   :  { %v1906_v18 = vmax.f32 %v1901_v15, 0.0  ;;  %v2589_v19 = vpop.f32.mrb[51].mxu1 }
0x10e4   :  { %v1907_v20 = vpack.c.bf16 %v1906_v18, %v1906_v18 }
0x10e6   :  { %2595 = vmatmul.mubr.msk.bf16.vlgmr.msra.gmra.mrb[32].mxu0 %vm1345_vm3, %v1907_v20 }
0x10e7   :  { %v2604_v21 = vpop.f32.mrb[52].mxu1  ;;  %2610 = vmatprep.mubr.msk.f32.mxu0 %vm2784_vm1, %v2783_v3  ;;  %v2814_v3 = vmov 1966171168  }
0x10e8   :  { %v2031_v24 = vpop.f32.mrb[53].mxu1  ;;  %v2040_v27 = vadd.f32 %v2604_v21, %v2361_v23  ;;  %v2048_v33 = vunpack.c.l.s4 %v2814_v3 }
0x10e9   :  { %v2605_v25 = vpop.f32.mrb[54].mxu1  ;;  %v2032_v22 = vadd.f32 %v2361_v23, %v2031_v24 }
0x10ea   :  { %v2043_v28 = vadd.f32 %v2605_v25, %v2361_v23  ;;  %v2034_v29 = vpop.f32.mrb[55].mxu1  ;;  %v2049_v34 = vunpack.c.0.s8 %v2048_v33 }
0x10eb   :  { %v2035_v26 = vadd.f32 %v2361_v23, %v2034_v29 }
0x10ec   :  { %v2625_v30 = vpack.c.bf16 %v2043_v28, %v2040_v27  ;;  %v2052_v37 = vsub.s32 %v2049_v34, %v2921_v63 }
0x10ed   :  { %v2621_v31 = vpack.c.bf16 %v2035_v26, %v2032_v22 }
0x10ee   :  { %2627 = vmatpush3.bf16.xpose.msk.msra.mxu1 %vm2622_vm6, %v2625_v30 }
0x10ef   :  { %2623 = vmatpush3.bf16.xpose.msk.msra.mxu0 %vm2622_vm6, %v2621_v31 }
0x11b9   :  { %v1968_v38 = vpop.f32.mrb[32].mxu0 }
0x11ba   :  { %v1969_v39 = vadd.f32 %v2357_v36, %v1968_v38  ;;  %v2596_v40 = vpop.f32.mrb[33].mxu0 }
0x11bb   :  { %v1971_v41 = vpop.f32.mrb[34].mxu0 }
0x11bc   :  { %v2053_v42 = vrot.slane %v1969_v39, %v2052_v37  ;;  %v2597_v43 = vpop.f32.mrb[35].mxu0 }
0x11be   :  { %v2054_v45 = vcombine.high %v2053_v42, %v2053_v42  ;;  %v2061_v48 = vrot.slane %v2053_v42, %v2052_v37 }
0x11c0   :  { %v2068_v49 = vrot.slane %v2054_v45, %v2052_v37  ;;  %2611 = vmatmul.mubr.msk.f32.vlgmr.msra.gmra.mrb[36].mxu0 %vm2069_vm5, %v2061_v48 }
0x11c2   :  { %2618 = vmatmul.mubr.msk.f32.vlgmr.msra.gmra.mrb[56].mxu1 %vm2069_vm5, %v2068_v49 }
0x1293   :  { %v2144_v63 = vpop.f32.mrb[36].mxu0 }
0x1294   :  { %2227 = vst.msk [vmem:[%s2267_s26] sm:$0x1] %vm2226_vm7, %v2144_v63  ;;  %v2612_v52 = vpop.f32.mrb[37].mxu0 }
0x1295   :  { %v2222_v55 = vpop.f32.mrb[56].mxu1 }
0x1296   :  { %2228 = vst.msk [vmem:[%s2267_s26 + $0x1] sm:$0x1] %vm2226_vm7, %v2222_v55  ;;  %v2619_v44 = vpop.f32.mrb[57].mxu1 }

</bundles_post_ra>
